<compile_context>
chip_gen: v7x
topology: tpu7x:2x2x1
jax: 0.10.0
libtpu: 0.0.40
codegen_flags: <defaults>
</compile_context>

<pallas_src>
import jax
import jax.numpy as jnp
from jax import lax
from jax.experimental import pallas as pl
from jax.experimental.pallas import tpu as pltpu


def _round_up(x, m):
    return (x + m - 1) // m * m


def lstm_pos_kernel(x_ref, w_ih_ref, w_hh_ref, b_ref, w_out_ref, b_out_ref,
                    out_ref, xw_ref, hs_ref, h_ref, c_ref):
    """Shapes (Hp = padded hidden, Op = padded output, both multiples of 128):
      x_ref:     (S, E)        w_ih_ref: (E, 4*Hp)   w_hh_ref: (Hp, 4*Hp)
      b_ref:     (1, 4*Hp)     w_out_ref:(Hp, Op)    b_out_ref:(1, Op)
      out_ref:   (S, Op)
      xw_ref:    (S, 4*Hp)  scratch (hoisted input projection)
      hs_ref:    (S, Hp)    scratch (all hidden states)
      h_ref/c_ref: (1, Hp)  scratch (LSTM carry)
    """
    Hp = h_ref.shape[1]
    S = x_ref.shape[0]

    # --- hoisted input projection: one full-sublane MXU matmul for all steps.
    xw_ref[...] = (jnp.dot(x_ref[...], w_ih_ref[...],
                           preferred_element_type=jnp.float32) + b_ref[...])

    h_ref[...] = jnp.zeros_like(h_ref)
    c_ref[...] = jnp.zeros_like(c_ref)

    # Loop-invariant: keep the recurrent weight resident instead of re-loading
    # it every iteration (JAX does not CSE per-iteration loads in fori_loop).
    w_hh = w_hh_ref[...]

    def step(t, carry):
        h = h_ref[...]
        c = c_ref[...]
        # Only the recurrent matmul remains on the serial critical path.
        gates = xw_ref[pl.ds(t, 1), :] + jnp.dot(
            h, w_hh, preferred_element_type=jnp.float32)        # (1, 4*Hp)

        # PyTorch gate order i, f, g, o; each block is Hp=128-lane aligned,
        # so these slices select whole vregs (no lane rotates).
        i_g = jax.nn.sigmoid(gates[:, 0 * Hp:1 * Hp])
        f_g = jax.nn.sigmoid(gates[:, 1 * Hp:2 * Hp])
        g_g = jnp.tanh(gates[:, 2 * Hp:3 * Hp])
        o_g = jax.nn.sigmoid(gates[:, 3 * Hp:4 * Hp])

        c_new = f_g * c + i_g * g_g
        h_new = o_g * jnp.tanh(c_new)
        h_ref[...] = h_new
        c_ref[...] = c_new
        hs_ref[pl.ds(t, 1), :] = h_new
        return carry

    # Fully unrolled: gives the scheduler cross-iteration visibility.
    lax.fori_loop(0, S, step, 0, unroll=True)

    # --- batched output Linear + log_softmax, single lane-dense store.
    logits = (jnp.dot(hs_ref[...], w_out_ref[...],
                      preferred_element_type=jnp.float32)
              + b_out_ref[...])                                  # (S, Op)
    m = jnp.max(logits, axis=1, keepdims=True)
    lse = jnp.log(jnp.sum(jnp.exp(logits - m), axis=1, keepdims=True)) + m
    out_ref[...] = logits - lse


@jax.jit
def lstm_pos_forward(token_ids, embed_table, w_ih, w_hh, b_ih, b_hh,
                     w_lin, b_lin):
    """Mirrors LSTMPos.forward.

    token_ids:  (S,)    int32
    embed_table:(V, E)  f32
    w_ih:       (4H, E) f32  (PyTorch weight_ih_l0 layout, gate order i,f,g,o)
    w_hh:       (4H, H) f32
    b_ih, b_hh: (4H,)   f32
    w_lin:      (O, H)  f32  (PyTorch nn.Linear layout)
    b_lin:      (O,)    f32
    returns:    (S, O)  f32 log-probabilities
    """
    S = token_ids.shape[0]
    E = embed_table.shape[1]
    H = w_hh.shape[1]
    O = w_lin.shape[0]
    Hp = _round_up(H, 128)      # pad each gate block to a full 128-lane vreg
    Op = _round_up(O, 128)      # lane-dense output store

    # Glue: embedding gather + weight repacking into padded, matmul-friendly
    # layouts.  Zero padding keeps the recurrence exact (padded h/c lanes stay
    # identically zero); padded output classes get bias -1e30 so they do not
    # perturb the log_softmax normalizer.
    # TODO(synk): fuse the embedding gather via scalar-prefetch once S*E grows.
    x = jnp.take(embed_table, token_ids, axis=0).astype(jnp.float32)  # (S, E)

    w_ih_g = jnp.pad(w_ih.reshape(4, H, E), ((0, 0), (0, Hp - H), (0, 0)))
    w_ih_p = jnp.transpose(w_ih_g, (2, 0, 1)).reshape(E, 4 * Hp)      # (E,4Hp)

    w_hh_g = jnp.pad(w_hh.reshape(4, H, H),
                     ((0, 0), (0, Hp - H), (0, Hp - H)))
    w_hh_p = jnp.transpose(w_hh_g, (2, 0, 1)).reshape(Hp, 4 * Hp)     # (Hp,4Hp)

    b_p = jnp.pad((b_ih + b_hh).reshape(4, H),
                  ((0, 0), (0, Hp - H))).reshape(1, 4 * Hp)           # (1,4Hp)

    w_out_p = jnp.pad(jnp.transpose(w_lin),
                      ((0, Hp - H), (0, Op - O)))                     # (Hp,Op)
    b_out_p = jnp.pad(b_lin, (0, Op - O),
                      constant_values=-1e30).reshape(1, Op)           # (1,Op)

    vmem = pl.BlockSpec(memory_space=pltpu.MemorySpace.VMEM)
    out_p = pl.pallas_call(
        lstm_pos_kernel,
        out_shape=jax.ShapeDtypeStruct((S, Op), jnp.float32),
        in_specs=[vmem] * 6,
        out_specs=vmem,
        scratch_shapes=[
            pltpu.VMEM((S, 4 * Hp), jnp.float32),   # hoisted input projection
            pltpu.VMEM((S, Hp), jnp.float32),       # all hidden states
            pltpu.VMEM((1, Hp), jnp.float32),       # h carry
            pltpu.VMEM((1, Hp), jnp.float32),       # c carry
        ],
    )(x, w_ih_p, w_hh_p, b_p, w_out_p, b_out_p)
    return out_p[:, :O]


def _reference_forward(token_ids, embed_table, w_ih, w_hh, b_ih, b_hh,
                       w_lin, b_lin):
    """Pure-JAX reference of the same PyTorch semantics (for validation)."""
    H = w_hh.shape[1]
    x = jnp.take(embed_table, token_ids, axis=0)

    def step(carry, x_t):
        h, c = carry
        gates = x_t @ w_ih.T + h @ w_hh.T + b_ih + b_hh
        i = jax.nn.sigmoid(gates[0 * H:1 * H])
        f = jax.nn.sigmoid(gates[1 * H:2 * H])
        g = jnp.tanh(gates[2 * H:3 * H])
        o = jax.nn.sigmoid(gates[3 * H:4 * H])
        c_new = f * c + i * g
        h_new = o * jnp.tanh(c_new)
        return (h_new, c_new), h_new

    h0 = jnp.zeros((H,), jnp.float32)
    (_, _), hs = lax.scan(step, (h0, h0), x)
    logits = hs @ w_lin.T + b_lin
    return jax.nn.log_softmax(logits, axis=1)


if __name__ == "__main__":
    # Small, forward-consistent sizes.
    vocab_size = 16
    embedding_size = 32
    hidden_size = 32
    output_size = 8
    seq_len = 8

    key = jax.random.PRNGKey(0)
    ks = jax.random.split(key, 8)

    token_ids = jax.random.randint(ks[0], (seq_len,), 0, vocab_size,
                                   dtype=jnp.int32)
    embed_table = jax.random.normal(ks[1], (vocab_size, embedding_size),
                                    jnp.float32)
    scale = 1.0 / jnp.sqrt(jnp.float32(hidden_size))
    w_ih = scale * jax.random.normal(ks[2], (4 * hidden_size, embedding_size),
                                     jnp.float32)
    w_hh = scale * jax.random.normal(ks[3], (4 * hidden_size, hidden_size),
                                     jnp.float32)
    b_ih = scale * jax.random.normal(ks[4], (4 * hidden_size,), jnp.float32)
    b_hh = scale * jax.random.normal(ks[5], (4 * hidden_size,), jnp.float32)
    w_lin = scale * jax.random.normal(ks[6], (output_size, hidden_size),
                                      jnp.float32)
    b_lin = scale * jax.random.normal(ks[7], (output_size,), jnp.float32)

    out = lstm_pos_forward(token_ids, embed_table, w_ih, w_hh, b_ih, b_hh,
                           w_lin, b_lin)
    out = jax.block_until_ready(out)

    ref = _reference_forward(token_ids, embed_table, w_ih, w_hh, b_ih, b_hh,
                             w_lin, b_lin)
    assert out.shape == (seq_len, output_size)
    assert jnp.allclose(out, ref, atol=1e-5, rtol=1e-5), "mismatch vs reference"

    print("KERNEL_OK")
</pallas_src>

<mosaic_0001>
module attributes {stable_mosaic.version = 11 : i64} {
  func.func @lstm_pos_kernel(%arg0: memref<8x32xf32, #tpu.memory_space<vmem>>, %arg1: memref<32x512xf32, #tpu.memory_space<vmem>>, %arg2: memref<128x512xf32, #tpu.memory_space<vmem>>, %arg3: memref<1x512xf32, #tpu.memory_space<vmem>>, %arg4: memref<128x128xf32, #tpu.memory_space<vmem>>, %arg5: memref<1x128xf32, #tpu.memory_space<vmem>>, %arg6: memref<8x128xf32, #tpu.memory_space<vmem>>, %arg7: memref<8x512xf32, #tpu.memory_space<vmem>>, %arg8: memref<8x128xf32, #tpu.memory_space<vmem>>, %arg9: memref<1x128xf32, #tpu.memory_space<vmem>>, %arg10: memref<1x128xf32, #tpu.memory_space<vmem>>) attributes {dimension_semantics = [], scalar_prefetch = 0 : i64, scratch_operands = 4 : i64, tpu.core_type = #tpu.core_type<tc>} {
    %c0 = arith.constant 0 : index
    %c0_0 = arith.constant 0 : index
    %0 = vector.load %arg0[%c0, %c0_0] : memref<8x32xf32, #tpu.memory_space<vmem>>, vector<8x32xf32>
    %c0_1 = arith.constant 0 : index
    %c0_2 = arith.constant 0 : index
    %1 = vector.load %arg1[%c0_1, %c0_2] : memref<32x512xf32, #tpu.memory_space<vmem>>, vector<32x512xf32>
    %cst = arith.constant dense<0.000000e+00> : vector<8x512xf32>
    %2 = tpu.matmul %0, %1, %cst {dimension_numbers = #tpu.dot_dimension_numbers<[1], [0], [0], [1], [0, 0, 1, 1], [], []>} : vector<8x32xf32>, vector<32x512xf32>, vector<8x512xf32> -> vector<8x512xf32>
    %c0_3 = arith.constant 0 : index
    %c0_4 = arith.constant 0 : index
    %3 = vector.load %arg3[%c0_3, %c0_4] : memref<1x512xf32, #tpu.memory_space<vmem>>, vector<1x512xf32>
    %4 = vector.broadcast %3 : vector<1x512xf32> to vector<8x512xf32>
    %5 = arith.addf %2, %4 : vector<8x512xf32>
    %c0_5 = arith.constant 0 : index
    %c0_6 = arith.constant 0 : index
    %6 = vector.load %arg7[%c0_5, %c0_6] : memref<8x512xf32, #tpu.memory_space<vmem>>, vector<8x512xf32>
    tpu.vector_store %arg7[%c0_5, %c0_6], %5 {strides = array<i32>} : memref<8x512xf32, #tpu.memory_space<vmem>>, vector<8x512xf32>,
    %cst_7 = arith.constant 0.000000e+00 : f32
    %7 = vector.broadcast %cst_7 : f32 to vector<1x128xf32>
    %c0_8 = arith.constant 0 : index
    %c0_9 = arith.constant 0 : index
    %8 = vector.load %arg9[%c0_8, %c0_9] : memref<1x128xf32, #tpu.memory_space<vmem>>, vector<1x128xf32>
    tpu.vector_store %arg9[%c0_8, %c0_9], %7 {strides = array<i32>} : memref<1x128xf32, #tpu.memory_space<vmem>>, vector<1x128xf32>,
    %cst_10 = arith.constant 0.000000e+00 : f32
    %9 = vector.broadcast %cst_10 : f32 to vector<1x128xf32>
    %c0_11 = arith.constant 0 : index
    %c0_12 = arith.constant 0 : index
    %10 = vector.load %arg10[%c0_11, %c0_12] : memref<1x128xf32, #tpu.memory_space<vmem>>, vector<1x128xf32>
    tpu.vector_store %arg10[%c0_11, %c0_12], %9 {strides = array<i32>} : memref<1x128xf32, #tpu.memory_space<vmem>>, vector<1x128xf32>,
    %c0_13 = arith.constant 0 : index
    %c0_14 = arith.constant 0 : index
    %11 = vector.load %arg2[%c0_13, %c0_14] : memref<128x512xf32, #tpu.memory_space<vmem>>, vector<128x512xf32>
    %c0_i32 = arith.constant 0 : i32
    %c0_15 = arith.constant 0 : index
    %c0_16 = arith.constant 0 : index
    %12 = vector.load %arg9[%c0_15, %c0_16] : memref<1x128xf32, #tpu.memory_space<vmem>>, vector<1x128xf32>
    %c0_17 = arith.constant 0 : index
    %c0_18 = arith.constant 0 : index
    %13 = vector.load %arg10[%c0_17, %c0_18] : memref<1x128xf32, #tpu.memory_space<vmem>>, vector<1x128xf32>
    %14 = arith.index_cast %c0_i32 : i32 to index
    %c0_19 = arith.constant 0 : index
    %15 = vector.load %arg7[%14, %c0_19] : memref<8x512xf32, #tpu.memory_space<vmem>>, vector<1x512xf32>
    %cst_20 = arith.constant dense<0.000000e+00> : vector<1x512xf32>
    %16 = tpu.matmul %12, %11, %cst_20 {dimension_numbers = #tpu.dot_dimension_numbers<[1], [0], [0], [1], [0, 0, 1, 1], [], []>} : vector<1x128xf32>, vector<128x512xf32>, vector<1x512xf32> -> vector<1x512xf32>
    %17 = arith.addf %15, %16 : vector<1x512xf32>
    %18 = vector.extract_strided_slice %17 {offsets = [0, 0], sizes = [1, 128], strides = [1, 1]} : vector<1x512xf32> to vector<1x128xf32>
    %19 = arith.negf %18 : vector<1x128xf32>
    %20 = math.exp %19 : vector<1x128xf32>
    %cst_21 = arith.constant 1.000000e+00 : f32
    %21 = vector.broadcast %cst_21 : f32 to vector<1x128xf32>
    %22 = arith.addf %21, %20 : vector<1x128xf32>
    %23 = arith.divf %21, %22 : vector<1x128xf32>
    %24 = vector.extract_strided_slice %17 {offsets = [0, 128], sizes = [1, 128], strides = [1, 1]} : vector<1x512xf32> to vector<1x128xf32>
    %25 = arith.negf %24 : vector<1x128xf32>
    %26 = math.exp %25 : vector<1x128xf32>
    %cst_22 = arith.constant 1.000000e+00 : f32
    %27 = vector.broadcast %cst_22 : f32 to vector<1x128xf32>
    %28 = arith.addf %27, %26 : vector<1x128xf32>
    %29 = arith.divf %27, %28 : vector<1x128xf32>
    %30 = vector.extract_strided_slice %17 {offsets = [0, 256], sizes = [1, 128], strides = [1, 1]} : vector<1x512xf32> to vector<1x128xf32>
    %31 = math.tanh %30 : vector<1x128xf32>
    %32 = vector.extract_strided_slice %17 {offsets = [0, 384], sizes = [1, 128], strides = [1, 1]} : vector<1x512xf32> to vector<1x128xf32>
    %33 = arith.negf %32 : vector<1x128xf32>
    %34 = math.exp %33 : vector<1x128xf32>
    %cst_23 = arith.constant 1.000000e+00 : f32
    %35 = vector.broadcast %cst_23 : f32 to vector<1x128xf32>
    %36 = arith.addf %35, %34 : vector<1x128xf32>
    %37 = arith.divf %35, %36 : vector<1x128xf32>
    %38 = arith.mulf %29, %13 : vector<1x128xf32>
    %39 = arith.mulf %23, %31 : vector<1x128xf32>
    %40 = arith.addf %38, %39 : vector<1x128xf32>
    %41 = math.tanh %40 : vector<1x128xf32>
    %42 = arith.mulf %37, %41 : vector<1x128xf32>
    %c0_24 = arith.constant 0 : index
    %c0_25 = arith.constant 0 : index
    %43 = vector.load %arg9[%c0_24, %c0_25] : memref<1x128xf32, #tpu.memory_space<vmem>>, vector<1x128xf32>
    tpu.vector_store %arg9[%c0_24, %c0_25], %42 {strides = array<i32>} : memref<1x128xf32, #tpu.memory_space<vmem>>, vector<1x128xf32>,
    %c0_26 = arith.constant 0 : index
    %c0_27 = arith.constant 0 : index
    %44 = vector.load %arg10[%c0_26, %c0_27] : memref<1x128xf32, #tpu.memory_space<vmem>>, vector<1x128xf32>
    tpu.vector_store %arg10[%c0_26, %c0_27], %40 {strides = array<i32>} : memref<1x128xf32, #tpu.memory_space<vmem>>, vector<1x128xf32>,
    %45 = arith.index_cast %c0_i32 : i32 to index
    %c0_28 = arith.constant 0 : index
    %46 = vector.load %arg8[%45, %c0_28] : memref<8x128xf32, #tpu.memory_space<vmem>>, vector<1x128xf32>
    tpu.vector_store %arg8[%45, %c0_28], %42 {strides = array<i32>} : memref<8x128xf32, #tpu.memory_space<vmem>>, vector<1x128xf32>,
    %c1_i32 = arith.constant 1 : i32
    %c0_29 = arith.constant 0 : index
    %c0_30 = arith.constant 0 : index
    %47 = vector.load %arg9[%c0_29, %c0_30] : memref<1x128xf32, #tpu.memory_space<vmem>>, vector<1x128xf32>
    %c0_31 = arith.constant 0 : index
    %c0_32 = arith.constant 0 : index
    %48 = vector.load %arg10[%c0_31, %c0_32] : memref<1x128xf32, #tpu.memory_space<vmem>>, vector<1x128xf32>
    %49 = arith.index_cast %c1_i32 : i32 to index
    %c0_33 = arith.constant 0 : index
    %50 = vector.load %arg7[%49, %c0_33] : memref<8x512xf32, #tpu.memory_space<vmem>>, vector<1x512xf32>
    %cst_34 = arith.constant dense<0.000000e+00> : vector<1x512xf32>
    %51 = tpu.matmul %47, %11, %cst_34 {dimension_numbers = #tpu.dot_dimension_numbers<[1], [0], [0], [1], [0, 0, 1, 1], [], []>} : vector<1x128xf32>, vector<128x512xf32>, vector<1x512xf32> -> vector<1x512xf32>
    %52 = arith.addf %50, %51 : vector<1x512xf32>
    %53 = vector.extract_strided_slice %52 {offsets = [0, 0], sizes = [1, 128], strides = [1, 1]} : vector<1x512xf32> to vector<1x128xf32>
    %54 = arith.negf %53 : vector<1x128xf32>
    %55 = math.exp %54 : vector<1x128xf32>
    %cst_35 = arith.constant 1.000000e+00 : f32
    %56 = vector.broadcast %cst_35 : f32 to vector<1x128xf32>
    %57 = arith.addf %56, %55 : vector<1x128xf32>
    %58 = arith.divf %56, %57 : vector<1x128xf32>
    %59 = vector.extract_strided_slice %52 {offsets = [0, 128], sizes = [1, 128], strides = [1, 1]} : vector<1x512xf32> to vector<1x128xf32>
    %60 = arith.negf %59 : vector<1x128xf32>
    %61 = math.exp %60 : vector<1x128xf32>
    %cst_36 = arith.constant 1.000000e+00 : f32
    %62 = vector.broadcast %cst_36 : f32 to vector<1x128xf32>
    %63 = arith.addf %62, %61 : vector<1x128xf32>
    %64 = arith.divf %62, %63 : vector<1x128xf32>
    %65 = vector.extract_strided_slice %52 {offsets = [0, 256], sizes = [1, 128], strides = [1, 1]} : vector<1x512xf32> to vector<1x128xf32>
    %66 = math.tanh %65 : vector<1x128xf32>
    %67 = vector.extract_strided_slice %52 {offsets = [0, 384], sizes = [1, 128], strides = [1, 1]} : vector<1x512xf32> to vector<1x128xf32>
    %68 = arith.negf %67 : vector<1x128xf32>
    %69 = math.exp %68 : vector<1x128xf32>
    %cst_37 = arith.constant 1.000000e+00 : f32
    %70 = vector.broadcast %cst_37 : f32 to vector<1x128xf32>
    %71 = arith.addf %70, %69 : vector<1x128xf32>
    %72 = arith.divf %70, %71 : vector<1x128xf32>
    %73 = arith.mulf %64, %48 : vector<1x128xf32>
    %74 = arith.mulf %58, %66 : vector<1x128xf32>
    %75 = arith.addf %73, %74 : vector<1x128xf32>
    %76 = math.tanh %75 : vector<1x128xf32>
    %77 = arith.mulf %72, %76 : vector<1x128xf32>
    %c0_38 = arith.constant 0 : index
    %c0_39 = arith.constant 0 : index
    %78 = vector.load %arg9[%c0_38, %c0_39] : memref<1x128xf32, #tpu.memory_space<vmem>>, vector<1x128xf32>
    tpu.vector_store %arg9[%c0_38, %c0_39], %77 {strides = array<i32>} : memref<1x128xf32, #tpu.memory_space<vmem>>, vector<1x128xf32>,
    %c0_40 = arith.constant 0 : index
    %c0_41 = arith.constant 0 : index
    %79 = vector.load %arg10[%c0_40, %c0_41] : memref<1x128xf32, #tpu.memory_space<vmem>>, vector<1x128xf32>
    tpu.vector_store %arg10[%c0_40, %c0_41], %75 {strides = array<i32>} : memref<1x128xf32, #tpu.memory_space<vmem>>, vector<1x128xf32>,
    %80 = arith.index_cast %c1_i32 : i32 to index
    %c0_42 = arith.constant 0 : index
    %81 = vector.load %arg8[%80, %c0_42] : memref<8x128xf32, #tpu.memory_space<vmem>>, vector<1x128xf32>
    tpu.vector_store %arg8[%80, %c0_42], %77 {strides = array<i32>} : memref<8x128xf32, #tpu.memory_space<vmem>>, vector<1x128xf32>,
    %c2_i32 = arith.constant 2 : i32
    %c0_43 = arith.constant 0 : index
    %c0_44 = arith.constant 0 : index
    %82 = vector.load %arg9[%c0_43, %c0_44] : memref<1x128xf32, #tpu.memory_space<vmem>>, vector<1x128xf32>
    %c0_45 = arith.constant 0 : index
    %c0_46 = arith.constant 0 : index
    %83 = vector.load %arg10[%c0_45, %c0_46] : memref<1x128xf32, #tpu.memory_space<vmem>>, vector<1x128xf32>
    %84 = arith.index_cast %c2_i32 : i32 to index
    %c0_47 = arith.constant 0 : index
    %85 = vector.load %arg7[%84, %c0_47] : memref<8x512xf32, #tpu.memory_space<vmem>>, vector<1x512xf32>
    %cst_48 = arith.constant dense<0.000000e+00> : vector<1x512xf32>
    %86 = tpu.matmul %82, %11, %cst_48 {dimension_numbers = #tpu.dot_dimension_numbers<[1], [0], [0], [1], [0, 0, 1, 1], [], []>} : vector<1x128xf32>, vector<128x512xf32>, vector<1x512xf32> -> vector<1x512xf32>
    %87 = arith.addf %85, %86 : vector<1x512xf32>
    %88 = vector.extract_strided_slice %87 {offsets = [0, 0], sizes = [1, 128], strides = [1, 1]} : vector<1x512xf32> to vector<1x128xf32>
    %89 = arith.negf %88 : vector<1x128xf32>
    %90 = math.exp %89 : vector<1x128xf32>
    %cst_49 = arith.constant 1.000000e+00 : f32
    %91 = vector.broadcast %cst_49 : f32 to vector<1x128xf32>
    %92 = arith.addf %91, %90 : vector<1x128xf32>
    %93 = arith.divf %91, %92 : vector<1x128xf32>
    %94 = vector.extract_strided_slice %87 {offsets = [0, 128], sizes = [1, 128], strides = [1, 1]} : vector<1x512xf32> to vector<1x128xf32>
    %95 = arith.negf %94 : vector<1x128xf32>
    %96 = math.exp %95 : vector<1x128xf32>
    %cst_50 = arith.constant 1.000000e+00 : f32
    %97 = vector.broadcast %cst_50 : f32 to vector<1x128xf32>
    %98 = arith.addf %97, %96 : vector<1x128xf32>
    %99 = arith.divf %97, %98 : vector<1x128xf32>
    %100 = vector.extract_strided_slice %87 {offsets = [0, 256], sizes = [1, 128], strides = [1, 1]} : vector<1x512xf32> to vector<1x128xf32>
    %101 = math.tanh %100 : vector<1x128xf32>
    %102 = vector.extract_strided_slice %87 {offsets = [0, 384], sizes = [1, 128], strides = [1, 1]} : vector<1x512xf32> to vector<1x128xf32>
    %103 = arith.negf %102 : vector<1x128xf32>
    %104 = math.exp %103 : vector<1x128xf32>
    %cst_51 = arith.constant 1.000000e+00 : f32
    %105 = vector.broadcast %cst_51 : f32 to vector<1x128xf32>
    %106 = arith.addf %105, %104 : vector<1x128xf32>
    %107 = arith.divf %105, %106 : vector<1x128xf32>
    %108 = arith.mulf %99, %83 : vector<1x128xf32>
    %109 = arith.mulf %93, %101 : vector<1x128xf32>
    %110 = arith.addf %108, %109 : vector<1x128xf32>
    %111 = math.tanh %110 : vector<1x128xf32>
    %112 = arith.mulf %107, %111 : vector<1x128xf32>
    %c0_52 = arith.constant 0 : index
    %c0_53 = arith.constant 0 : index
    %113 = vector.load %arg9[%c0_52, %c0_53] : memref<1x128xf32, #tpu.memory_space<vmem>>, vector<1x128xf32>
    tpu.vector_store %arg9[%c0_52, %c0_53], %112 {strides = array<i32>} : memref<1x128xf32, #tpu.memory_space<vmem>>, vector<1x128xf32>,
    %c0_54 = arith.constant 0 : index
    %c0_55 = arith.constant 0 : index
    %114 = vector.load %arg10[%c0_54, %c0_55] : memref<1x128xf32, #tpu.memory_space<vmem>>, vector<1x128xf32>
    tpu.vector_store %arg10[%c0_54, %c0_55], %110 {strides = array<i32>} : memref<1x128xf32, #tpu.memory_space<vmem>>, vector<1x128xf32>,
    %115 = arith.index_cast %c2_i32 : i32 to index
    %c0_56 = arith.constant 0 : index
    %116 = vector.load %arg8[%115, %c0_56] : memref<8x128xf32, #tpu.memory_space<vmem>>, vector<1x128xf32>
    tpu.vector_store %arg8[%115, %c0_56], %112 {strides = array<i32>} : memref<8x128xf32, #tpu.memory_space<vmem>>, vector<1x128xf32>,
    %c3_i32 = arith.constant 3 : i32
    %c0_57 = arith.constant 0 : index
    %c0_58 = arith.constant 0 : index
    %117 = vector.load %arg9[%c0_57, %c0_58] : memref<1x128xf32, #tpu.memory_space<vmem>>, vector<1x128xf32>
    %c0_59 = arith.constant 0 : index
    %c0_60 = arith.constant 0 : index
    %118 = vector.load %arg10[%c0_59, %c0_60] : memref<1x128xf32, #tpu.memory_space<vmem>>, vector<1x128xf32>
    %119 = arith.index_cast %c3_i32 : i32 to index
    %c0_61 = arith.constant 0 : index
    %120 = vector.load %arg7[%119, %c0_61] : memref<8x512xf32, #tpu.memory_space<vmem>>, vector<1x512xf32>
    %cst_62 = arith.constant dense<0.000000e+00> : vector<1x512xf32>
    %121 = tpu.matmul %117, %11, %cst_62 {dimension_numbers = #tpu.dot_dimension_numbers<[1], [0], [0], [1], [0, 0, 1, 1], [], []>} : vector<1x128xf32>, vector<128x512xf32>, vector<1x512xf32> -> vector<1x512xf32>
    %122 = arith.addf %120, %121 : vector<1x512xf32>
    %123 = vector.extract_strided_slice %122 {offsets = [0, 0], sizes = [1, 128], strides = [1, 1]} : vector<1x512xf32> to vector<1x128xf32>
    %124 = arith.negf %123 : vector<1x128xf32>
    %125 = math.exp %124 : vector<1x128xf32>
    %cst_63 = arith.constant 1.000000e+00 : f32
    %126 = vector.broadcast %cst_63 : f32 to vector<1x128xf32>
    %127 = arith.addf %126, %125 : vector<1x128xf32>
    %128 = arith.divf %126, %127 : vector<1x128xf32>
    %129 = vector.extract_strided_slice %122 {offsets = [0, 128], sizes = [1, 128], strides = [1, 1]} : vector<1x512xf32> to vector<1x128xf32>
    %130 = arith.negf %129 : vector<1x128xf32>
    %131 = math.exp %130 : vector<1x128xf32>
    %cst_64 = arith.constant 1.000000e+00 : f32
    %132 = vector.broadcast %cst_64 : f32 to vector<1x128xf32>
    %133 = arith.addf %132, %131 : vector<1x128xf32>
    %134 = arith.divf %132, %133 : vector<1x128xf32>
    %135 = vector.extract_strided_slice %122 {offsets = [0, 256], sizes = [1, 128], strides = [1, 1]} : vector<1x512xf32> to vector<1x128xf32>
    %136 = math.tanh %135 : vector<1x128xf32>
    %137 = vector.extract_strided_slice %122 {offsets = [0, 384], sizes = [1, 128], strides = [1, 1]} : vector<1x512xf32> to vector<1x128xf32>
    %138 = arith.negf %137 : vector<1x128xf32>
    %139 = math.exp %138 : vector<1x128xf32>
    %cst_65 = arith.constant 1.000000e+00 : f32
    %140 = vector.broadcast %cst_65 : f32 to vector<1x128xf32>
    %141 = arith.addf %140, %139 : vector<1x128xf32>
    %142 = arith.divf %140, %141 : vector<1x128xf32>
    %143 = arith.mulf %134, %118 : vector<1x128xf32>
    %144 = arith.mulf %128, %136 : vector<1x128xf32>
    %145 = arith.addf %143, %144 : vector<1x128xf32>
    %146 = math.tanh %145 : vector<1x128xf32>
    %147 = arith.mulf %142, %146 : vector<1x128xf32>
    %c0_66 = arith.constant 0 : index
    %c0_67 = arith.constant 0 : index
    %148 = vector.load %arg9[%c0_66, %c0_67] : memref<1x128xf32, #tpu.memory_space<vmem>>, vector<1x128xf32>
    tpu.vector_store %arg9[%c0_66, %c0_67], %147 {strides = array<i32>} : memref<1x128xf32, #tpu.memory_space<vmem>>, vector<1x128xf32>,
    %c0_68 = arith.constant 0 : index
    %c0_69 = arith.constant 0 : index
    %149 = vector.load %arg10[%c0_68, %c0_69] : memref<1x128xf32, #tpu.memory_space<vmem>>, vector<1x128xf32>
    tpu.vector_store %arg10[%c0_68, %c0_69], %145 {strides = array<i32>} : memref<1x128xf32, #tpu.memory_space<vmem>>, vector<1x128xf32>,
    %150 = arith.index_cast %c3_i32 : i32 to index
    %c0_70 = arith.constant 0 : index
    %151 = vector.load %arg8[%150, %c0_70] : memref<8x128xf32, #tpu.memory_space<vmem>>, vector<1x128xf32>
    tpu.vector_store %arg8[%150, %c0_70], %147 {strides = array<i32>} : memref<8x128xf32, #tpu.memory_space<vmem>>, vector<1x128xf32>,
    %c4_i32 = arith.constant 4 : i32
    %c0_71 = arith.constant 0 : index
    %c0_72 = arith.constant 0 : index
    %152 = vector.load %arg9[%c0_71, %c0_72] : memref<1x128xf32, #tpu.memory_space<vmem>>, vector<1x128xf32>
    %c0_73 = arith.constant 0 : index
    %c0_74 = arith.constant 0 : index
    %153 = vector.load %arg10[%c0_73, %c0_74] : memref<1x128xf32, #tpu.memory_space<vmem>>, vector<1x128xf32>
    %154 = arith.index_cast %c4_i32 : i32 to index
    %c0_75 = arith.constant 0 : index
    %155 = vector.load %arg7[%154, %c0_75] : memref<8x512xf32, #tpu.memory_space<vmem>>, vector<1x512xf32>
    %cst_76 = arith.constant dense<0.000000e+00> : vector<1x512xf32>
    %156 = tpu.matmul %152, %11, %cst_76 {dimension_numbers = #tpu.dot_dimension_numbers<[1], [0], [0], [1], [0, 0, 1, 1], [], []>} : vector<1x128xf32>, vector<128x512xf32>, vector<1x512xf32> -> vector<1x512xf32>
    %157 = arith.addf %155, %156 : vector<1x512xf32>
    %158 = vector.extract_strided_slice %157 {offsets = [0, 0], sizes = [1, 128], strides = [1, 1]} : vector<1x512xf32> to vector<1x128xf32>
    %159 = arith.negf %158 : vector<1x128xf32>
    %160 = math.exp %159 : vector<1x128xf32>
    %cst_77 = arith.constant 1.000000e+00 : f32
    %161 = vector.broadcast %cst_77 : f32 to vector<1x128xf32>
    %162 = arith.addf %161, %160 : vector<1x128xf32>
    %163 = arith.divf %161, %162 : vector<1x128xf32>
    %164 = vector.extract_strided_slice %157 {offsets = [0, 128], sizes = [1, 128], strides = [1, 1]} : vector<1x512xf32> to vector<1x128xf32>
    %165 = arith.negf %164 : vector<1x128xf32>
    %166 = math.exp %165 : vector<1x128xf32>
    %cst_78 = arith.constant 1.000000e+00 : f32
    %167 = vector.broadcast %cst_78 : f32 to vector<1x128xf32>
    %168 = arith.addf %167, %166 : vector<1x128xf32>
    %169 = arith.divf %167, %168 : vector<1x128xf32>
    %170 = vector.extract_strided_slice %157 {offsets = [0, 256], sizes = [1, 128], strides = [1, 1]} : vector<1x512xf32> to vector<1x128xf32>
    %171 = math.tanh %170 : vector<1x128xf32>
    %172 = vector.extract_strided_slice %157 {offsets = [0, 384], sizes = [1, 128], strides = [1, 1]} : vector<1x512xf32> to vector<1x128xf32>
    %173 = arith.negf %172 : vector<1x128xf32>
    %174 = math.exp %173 : vector<1x128xf32>
    %cst_79 = arith.constant 1.000000e+00 : f32
    %175 = vector.broadcast %cst_79 : f32 to vector<1x128xf32>
    %176 = arith.addf %175, %174 : vector<1x128xf32>
    %177 = arith.divf %175, %176 : vector<1x128xf32>
    %178 = arith.mulf %169, %153 : vector<1x128xf32>
    %179 = arith.mulf %163, %171 : vector<1x128xf32>
    %180 = arith.addf %178, %179 : vector<1x128xf32>
    %181 = math.tanh %180 : vector<1x128xf32>
    %182 = arith.mulf %177, %181 : vector<1x128xf32>
    %c0_80 = arith.constant 0 : index
    %c0_81 = arith.constant 0 : index
    %183 = vector.load %arg9[%c0_80, %c0_81] : memref<1x128xf32, #tpu.memory_space<vmem>>, vector<1x128xf32>
    tpu.vector_store %arg9[%c0_80, %c0_81], %182 {strides = array<i32>} : memref<1x128xf32, #tpu.memory_space<vmem>>, vector<1x128xf32>,
    %c0_82 = arith.constant 0 : index
    %c0_83 = arith.constant 0 : index
    %184 = vector.load %arg10[%c0_82, %c0_83] : memref<1x128xf32, #tpu.memory_space<vmem>>, vector<1x128xf32>
    tpu.vector_store %arg10[%c0_82, %c0_83], %180 {strides = array<i32>} : memref<1x128xf32, #tpu.memory_space<vmem>>, vector<1x128xf32>,
    %185 = arith.index_cast %c4_i32 : i32 to index
    %c0_84 = arith.constant 0 : index
    %186 = vector.load %arg8[%185, %c0_84] : memref<8x128xf32, #tpu.memory_space<vmem>>, vector<1x128xf32>
    tpu.vector_store %arg8[%185, %c0_84], %182 {strides = array<i32>} : memref<8x128xf32, #tpu.memory_space<vmem>>, vector<1x128xf32>,
    %c5_i32 = arith.constant 5 : i32
    %c0_85 = arith.constant 0 : index
    %c0_86 = arith.constant 0 : index
    %187 = vector.load %arg9[%c0_85, %c0_86] : memref<1x128xf32, #tpu.memory_space<vmem>>, vector<1x128xf32>
    %c0_87 = arith.constant 0 : index
    %c0_88 = arith.constant 0 : index
    %188 = vector.load %arg10[%c0_87, %c0_88] : memref<1x128xf32, #tpu.memory_space<vmem>>, vector<1x128xf32>
    %189 = arith.index_cast %c5_i32 : i32 to index
    %c0_89 = arith.constant 0 : index
    %190 = vector.load %arg7[%189, %c0_89] : memref<8x512xf32, #tpu.memory_space<vmem>>, vector<1x512xf32>
    %cst_90 = arith.constant dense<0.000000e+00> : vector<1x512xf32>
    %191 = tpu.matmul %187, %11, %cst_90 {dimension_numbers = #tpu.dot_dimension_numbers<[1], [0], [0], [1], [0, 0, 1, 1], [], []>} : vector<1x128xf32>, vector<128x512xf32>, vector<1x512xf32> -> vector<1x512xf32>
    %192 = arith.addf %190, %191 : vector<1x512xf32>
    %193 = vector.extract_strided_slice %192 {offsets = [0, 0], sizes = [1, 128], strides = [1, 1]} : vector<1x512xf32> to vector<1x128xf32>
    %194 = arith.negf %193 : vector<1x128xf32>
    %195 = math.exp %194 : vector<1x128xf32>
    %cst_91 = arith.constant 1.000000e+00 : f32
    %196 = vector.broadcast %cst_91 : f32 to vector<1x128xf32>
    %197 = arith.addf %196, %195 : vector<1x128xf32>
    %198 = arith.divf %196, %197 : vector<1x128xf32>
    %199 = vector.extract_strided_slice %192 {offsets = [0, 128], sizes = [1, 128], strides = [1, 1]} : vector<1x512xf32> to vector<1x128xf32>
    %200 = arith.negf %199 : vector<1x128xf32>
    %201 = math.exp %200 : vector<1x128xf32>
    %cst_92 = arith.constant 1.000000e+00 : f32
    %202 = vector.broadcast %cst_92 : f32 to vector<1x128xf32>
    %203 = arith.addf %202, %201 : vector<1x128xf32>
    %204 = arith.divf %202, %203 : vector<1x128xf32>
    %205 = vector.extract_strided_slice %192 {offsets = [0, 256], sizes = [1, 128], strides = [1, 1]} : vector<1x512xf32> to vector<1x128xf32>
    %206 = math.tanh %205 : vector<1x128xf32>
    %207 = vector.extract_strided_slice %192 {offsets = [0, 384], sizes = [1, 128], strides = [1, 1]} : vector<1x512xf32> to vector<1x128xf32>
    %208 = arith.negf %207 : vector<1x128xf32>
    %209 = math.exp %208 : vector<1x128xf32>
    %cst_93 = arith.constant 1.000000e+00 : f32
    %210 = vector.broadcast %cst_93 : f32 to vector<1x128xf32>
    %211 = arith.addf %210, %209 : vector<1x128xf32>
    %212 = arith.divf %210, %211 : vector<1x128xf32>
    %213 = arith.mulf %204, %188 : vector<1x128xf32>
    %214 = arith.mulf %198, %206 : vector<1x128xf32>
    %215 = arith.addf %213, %214 : vector<1x128xf32>
    %216 = math.tanh %215 : vector<1x128xf32>
    %217 = arith.mulf %212, %216 : vector<1x128xf32>
    %c0_94 = arith.constant 0 : index
    %c0_95 = arith.constant 0 : index
    %218 = vector.load %arg9[%c0_94, %c0_95] : memref<1x128xf32, #tpu.memory_space<vmem>>, vector<1x128xf32>
    tpu.vector_store %arg9[%c0_94, %c0_95], %217 {strides = array<i32>} : memref<1x128xf32, #tpu.memory_space<vmem>>, vector<1x128xf32>,
    %c0_96 = arith.constant 0 : index
    %c0_97 = arith.constant 0 : index
    %219 = vector.load %arg10[%c0_96, %c0_97] : memref<1x128xf32, #tpu.memory_space<vmem>>, vector<1x128xf32>
    tpu.vector_store %arg10[%c0_96, %c0_97], %215 {strides = array<i32>} : memref<1x128xf32, #tpu.memory_space<vmem>>, vector<1x128xf32>,
    %220 = arith.index_cast %c5_i32 : i32 to index
    %c0_98 = arith.constant 0 : index
    %221 = vector.load %arg8[%220, %c0_98] : memref<8x128xf32, #tpu.memory_space<vmem>>, vector<1x128xf32>
    tpu.vector_store %arg8[%220, %c0_98], %217 {strides = array<i32>} : memref<8x128xf32, #tpu.memory_space<vmem>>, vector<1x128xf32>,
    %c6_i32 = arith.constant 6 : i32
    %c0_99 = arith.constant 0 : index
    %c0_100 = arith.constant 0 : index
    %222 = vector.load %arg9[%c0_99, %c0_100] : memref<1x128xf32, #tpu.memory_space<vmem>>, vector<1x128xf32>
    %c0_101 = arith.constant 0 : index
    %c0_102 = arith.constant 0 : index
    %223 = vector.load %arg10[%c0_101, %c0_102] : memref<1x128xf32, #tpu.memory_space<vmem>>, vector<1x128xf32>
    %224 = arith.index_cast %c6_i32 : i32 to index
    %c0_103 = arith.constant 0 : index
    %225 = vector.load %arg7[%224, %c0_103] : memref<8x512xf32, #tpu.memory_space<vmem>>, vector<1x512xf32>
    %cst_104 = arith.constant dense<0.000000e+00> : vector<1x512xf32>
    %226 = tpu.matmul %222, %11, %cst_104 {dimension_numbers = #tpu.dot_dimension_numbers<[1], [0], [0], [1], [0, 0, 1, 1], [], []>} : vector<1x128xf32>, vector<128x512xf32>, vector<1x512xf32> -> vector<1x512xf32>
    %227 = arith.addf %225, %226 : vector<1x512xf32>
    %228 = vector.extract_strided_slice %227 {offsets = [0, 0], sizes = [1, 128], strides = [1, 1]} : vector<1x512xf32> to vector<1x128xf32>
    %229 = arith.negf %228 : vector<1x128xf32>
    %230 = math.exp %229 : vector<1x128xf32>
    %cst_105 = arith.constant 1.000000e+00 : f32
    %231 = vector.broadcast %cst_105 : f32 to vector<1x128xf32>
    %232 = arith.addf %231, %230 : vector<1x128xf32>
    %233 = arith.divf %231, %232 : vector<1x128xf32>
    %234 = vector.extract_strided_slice %227 {offsets = [0, 128], sizes = [1, 128], strides = [1, 1]} : vector<1x512xf32> to vector<1x128xf32>
    %235 = arith.negf %234 : vector<1x128xf32>
    %236 = math.exp %235 : vector<1x128xf32>
    %cst_106 = arith.constant 1.000000e+00 : f32
    %237 = vector.broadcast %cst_106 : f32 to vector<1x128xf32>
    %238 = arith.addf %237, %236 : vector<1x128xf32>
    %239 = arith.divf %237, %238 : vector<1x128xf32>
    %240 = vector.extract_strided_slice %227 {offsets = [0, 256], sizes = [1, 128], strides = [1, 1]} : vector<1x512xf32> to vector<1x128xf32>
    %241 = math.tanh %240 : vector<1x128xf32>
    %242 = vector.extract_strided_slice %227 {offsets = [0, 384], sizes = [1, 128], strides = [1, 1]} : vector<1x512xf32> to vector<1x128xf32>
    %243 = arith.negf %242 : vector<1x128xf32>
    %244 = math.exp %243 : vector<1x128xf32>
    %cst_107 = arith.constant 1.000000e+00 : f32
    %245 = vector.broadcast %cst_107 : f32 to vector<1x128xf32>
    %246 = arith.addf %245, %244 : vector<1x128xf32>
    %247 = arith.divf %245, %246 : vector<1x128xf32>
    %248 = arith.mulf %239, %223 : vector<1x128xf32>
    %249 = arith.mulf %233, %241 : vector<1x128xf32>
    %250 = arith.addf %248, %249 : vector<1x128xf32>
    %251 = math.tanh %250 : vector<1x128xf32>
    %252 = arith.mulf %247, %251 : vector<1x128xf32>
    %c0_108 = arith.constant 0 : index
    %c0_109 = arith.constant 0 : index
    %253 = vector.load %arg9[%c0_108, %c0_109] : memref<1x128xf32, #tpu.memory_space<vmem>>, vector<1x128xf32>
    tpu.vector_store %arg9[%c0_108, %c0_109], %252 {strides = array<i32>} : memref<1x128xf32, #tpu.memory_space<vmem>>, vector<1x128xf32>,
    %c0_110 = arith.constant 0 : index
    %c0_111 = arith.constant 0 : index
    %254 = vector.load %arg10[%c0_110, %c0_111] : memref<1x128xf32, #tpu.memory_space<vmem>>, vector<1x128xf32>
    tpu.vector_store %arg10[%c0_110, %c0_111], %250 {strides = array<i32>} : memref<1x128xf32, #tpu.memory_space<vmem>>, vector<1x128xf32>,
    %255 = arith.index_cast %c6_i32 : i32 to index
    %c0_112 = arith.constant 0 : index
    %256 = vector.load %arg8[%255, %c0_112] : memref<8x128xf32, #tpu.memory_space<vmem>>, vector<1x128xf32>
    tpu.vector_store %arg8[%255, %c0_112], %252 {strides = array<i32>} : memref<8x128xf32, #tpu.memory_space<vmem>>, vector<1x128xf32>,
    %c7_i32 = arith.constant 7 : i32
    %c0_113 = arith.constant 0 : index
    %c0_114 = arith.constant 0 : index
    %257 = vector.load %arg9[%c0_113, %c0_114] : memref<1x128xf32, #tpu.memory_space<vmem>>, vector<1x128xf32>
    %c0_115 = arith.constant 0 : index
    %c0_116 = arith.constant 0 : index
    %258 = vector.load %arg10[%c0_115, %c0_116] : memref<1x128xf32, #tpu.memory_space<vmem>>, vector<1x128xf32>
    %259 = arith.index_cast %c7_i32 : i32 to index
    %c0_117 = arith.constant 0 : index
    %260 = vector.load %arg7[%259, %c0_117] : memref<8x512xf32, #tpu.memory_space<vmem>>, vector<1x512xf32>
    %cst_118 = arith.constant dense<0.000000e+00> : vector<1x512xf32>
    %261 = tpu.matmul %257, %11, %cst_118 {dimension_numbers = #tpu.dot_dimension_numbers<[1], [0], [0], [1], [0, 0, 1, 1], [], []>} : vector<1x128xf32>, vector<128x512xf32>, vector<1x512xf32> -> vector<1x512xf32>
    %262 = arith.addf %260, %261 : vector<1x512xf32>
    %263 = vector.extract_strided_slice %262 {offsets = [0, 0], sizes = [1, 128], strides = [1, 1]} : vector<1x512xf32> to vector<1x128xf32>
    %264 = arith.negf %263 : vector<1x128xf32>
    %265 = math.exp %264 : vector<1x128xf32>
    %cst_119 = arith.constant 1.000000e+00 : f32
    %266 = vector.broadcast %cst_119 : f32 to vector<1x128xf32>
    %267 = arith.addf %266, %265 : vector<1x128xf32>
    %268 = arith.divf %266, %267 : vector<1x128xf32>
    %269 = vector.extract_strided_slice %262 {offsets = [0, 128], sizes = [1, 128], strides = [1, 1]} : vector<1x512xf32> to vector<1x128xf32>
    %270 = arith.negf %269 : vector<1x128xf32>
    %271 = math.exp %270 : vector<1x128xf32>
    %cst_120 = arith.constant 1.000000e+00 : f32
    %272 = vector.broadcast %cst_120 : f32 to vector<1x128xf32>
    %273 = arith.addf %272, %271 : vector<1x128xf32>
    %274 = arith.divf %272, %273 : vector<1x128xf32>
    %275 = vector.extract_strided_slice %262 {offsets = [0, 256], sizes = [1, 128], strides = [1, 1]} : vector<1x512xf32> to vector<1x128xf32>
    %276 = math.tanh %275 : vector<1x128xf32>
    %277 = vector.extract_strided_slice %262 {offsets = [0, 384], sizes = [1, 128], strides = [1, 1]} : vector<1x512xf32> to vector<1x128xf32>
    %278 = arith.negf %277 : vector<1x128xf32>
    %279 = math.exp %278 : vector<1x128xf32>
    %cst_121 = arith.constant 1.000000e+00 : f32
    %280 = vector.broadcast %cst_121 : f32 to vector<1x128xf32>
    %281 = arith.addf %280, %279 : vector<1x128xf32>
    %282 = arith.divf %280, %281 : vector<1x128xf32>
    %283 = arith.mulf %274, %258 : vector<1x128xf32>
    %284 = arith.mulf %268, %276 : vector<1x128xf32>
    %285 = arith.addf %283, %284 : vector<1x128xf32>
    %286 = math.tanh %285 : vector<1x128xf32>
    %287 = arith.mulf %282, %286 : vector<1x128xf32>
    %c0_122 = arith.constant 0 : index
    %c0_123 = arith.constant 0 : index
    %288 = vector.load %arg9[%c0_122, %c0_123] : memref<1x128xf32, #tpu.memory_space<vmem>>, vector<1x128xf32>
    tpu.vector_store %arg9[%c0_122, %c0_123], %287 {strides = array<i32>} : memref<1x128xf32, #tpu.memory_space<vmem>>, vector<1x128xf32>,
    %c0_124 = arith.constant 0 : index
    %c0_125 = arith.constant 0 : index
    %289 = vector.load %arg10[%c0_124, %c0_125] : memref<1x128xf32, #tpu.memory_space<vmem>>, vector<1x128xf32>
    tpu.vector_store %arg10[%c0_124, %c0_125], %285 {strides = array<i32>} : memref<1x128xf32, #tpu.memory_space<vmem>>, vector<1x128xf32>,
    %290 = arith.index_cast %c7_i32 : i32 to index
    %c0_126 = arith.constant 0 : index
    %291 = vector.load %arg8[%290, %c0_126] : memref<8x128xf32, #tpu.memory_space<vmem>>, vector<1x128xf32>
    tpu.vector_store %arg8[%290, %c0_126], %287 {strides = array<i32>} : memref<8x128xf32, #tpu.memory_space<vmem>>, vector<1x128xf32>,
    %c8_i32 = arith.constant 8 : i32
    %c0_127 = arith.constant 0 : index
    %c0_128 = arith.constant 0 : index
    %292 = vector.load %arg8[%c0_127, %c0_128] : memref<8x128xf32, #tpu.memory_space<vmem>>, vector<8x128xf32>
    %c0_129 = arith.constant 0 : index
    %c0_130 = arith.constant 0 : index
    %293 = vector.load %arg4[%c0_129, %c0_130] : memref<128x128xf32, #tpu.memory_space<vmem>>, vector<128x128xf32>
    %cst_131 = arith.constant dense<0.000000e+00> : vector<8x128xf32>
    %294 = tpu.matmul %292, %293, %cst_131 {dimension_numbers = #tpu.dot_dimension_numbers<[1], [0], [0], [1], [0, 0, 1, 1], [], []>} : vector<8x128xf32>, vector<128x128xf32>, vector<8x128xf32> -> vector<8x128xf32>
    %c0_132 = arith.constant 0 : index
    %c0_133 = arith.constant 0 : index
    %295 = vector.load %arg5[%c0_132, %c0_133] : memref<1x128xf32, #tpu.memory_space<vmem>>, vector<1x128xf32>
    %296 = vector.broadcast %295 : vector<1x128xf32> to vector<8x128xf32>
    %297 = arith.addf %294, %296 : vector<8x128xf32>
    %cst_134 = arith.constant dense<0xFF800000> : vector<8xf32>
    %298 = vector.multi_reduction <maximumf>, %297, %cst_134 [1] : vector<8x128xf32> to vector<8xf32>
    %299 = vector.shape_cast %298 : vector<8xf32> to vector<8x1xf32>
    %300 = vector.broadcast %299 : vector<8x1xf32> to vector<8x128xf32>
    %301 = arith.subf %297, %300 : vector<8x128xf32>
    %302 = math.exp %301 : vector<8x128xf32>
    %cst_135 = arith.constant dense<0.000000e+00> : vector<8xf32>
    %303 = vector.multi_reduction <add>, %302, %cst_135 [1] : vector<8x128xf32> to vector<8xf32>
    %304 = vector.shape_cast %303 : vector<8xf32> to vector<8x1xf32>
    %305 = math.log %304 : vector<8x1xf32>
    %306 = arith.addf %305, %299 : vector<8x1xf32>
    %307 = vector.broadcast %306 : vector<8x1xf32> to vector<8x128xf32>
    %308 = arith.subf %297, %307 : vector<8x128xf32>
    %c0_136 = arith.constant 0 : index
    %c0_137 = arith.constant 0 : index
    %309 = vector.load %arg6[%c0_136, %c0_137] : memref<8x128xf32, #tpu.memory_space<vmem>>, vector<8x128xf32>
    tpu.vector_store %arg6[%c0_136, %c0_137], %308 {strides = array<i32>} : memref<8x128xf32, #tpu.memory_space<vmem>>, vector<8x128xf32>,
    return
  }
}

</mosaic_0001>

<bundles_post_ra>
// kernel: lstm_pos_forward.1
= control target key start
LH: loop header
LB: loop body
LE: loop exit
PB: predicated region body
PF: predicated region fallthrough
CT: control target
= control target key end

     0   :  { %v2870_v7 = vmov 0.0   ;;  %vm63_vm0 = vcmask 261120   ;;  %s3588_s0 = inlined_call_operand.vmem [shape: f32[8,32], index: 0, kind: input, shape index: {}]   ;;  %s3589_s1 = inlined_call_operand.vmem [shape: f32[32,512], index: 1, kind: input, shape index: {}]   ;;  %s3590_s2 = inlined_call_operand.vmem [shape: f32[128,512], index: 2, kind: input, shape index: {}]   ;;  %s3591_s3 = inlined_call_operand.vmem [shape: f32[1,512], index: 3, kind: input, shape index: {}]   ;;  %s3592_s4 = inlined_call_operand.vmem [shape: f32[128,128], index: 4, kind: input, shape index: {}]   ;;  %s3593_s5 = inlined_call_operand.vmem [shape: f32[1,128], index: 5, kind: input, shape index: {}]   ;;  %s3594_s6 = inlined_call_operand.hbm [shape: f32[8,128], index: 6, kind: output, shape index: {}]  }
   0x1   :  { %v26_v0 = vld [vmem:[%s3589_s1 + $0x8] sm:$0xff]  ;;  %v25_v2 = vld [vmem:[%s3589_s1] sm:$0xff]  ;;  %131 = vmatprep.mubr.f32.mxu1 %v2870_v7  ;;  %213 = vst [vmem:[#allocation4] sm:$0x1] %v2870_v7  ;;  %214 = vst [vmem:[#allocation5] sm:$0x1] %v2870_v7  ;;  %346 = vmatprep.mubr.f32.mxu0 %v2870_v7 }
   0x2   :  { %v30_v1 = vld [vmem:[%s3589_s1 + $0x28] sm:$0xff]  ;;  %v29_v4 = vld [vmem:[%s3589_s1 + $0x20] sm:$0xff]  ;;  %v28_v12 = vld [vmem:[%s3589_s1 + $0x18] sm:$0xff] }
   0x3   :  { %v2157_v3 = vpack.c.bf16 %v30_v1, %v26_v0  ;;  %v34_v5 = vld [vmem:[%s3589_s1 + $0x48] sm:$0xff]  ;;  %v2159_v8 = vpack.c.bf16 %v29_v4, %v25_v2  ;;  %v33_v10 = vld [vmem:[%s3589_s1 + $0x40] sm:$0xff]  ;;  %v32_v13 = vld [vmem:[%s3589_s1 + $0x38] sm:$0xff] }
   0x4   :  { %v38_v6 = vld [vmem:[%s3589_s1 + $0x68] sm:$0xff]  ;;  %v37_v11 = vld [vmem:[%s3589_s1 + $0x60] sm:$0xff]  ;;  %v27_v15 = vld [vmem:[%s3589_s1 + $0x10] sm:$0xff]  ;;  %v2165_v17 = vpack.c.bf16 %v32_v13, %v28_v12 }
   0x5   :  { %v2161_v9 = vpack.c.bf16 %v38_v6, %v34_v5  ;;  %2158 = vmatprep.subr.bf16.mxu1 %v2157_v3  ;;  %v2163_v14 = vpack.c.bf16 %v37_v11, %v33_v10  ;;  %v31_v16 = vld [vmem:[%s3589_s1 + $0x30] sm:$0xff]  ;;  %v36_v18 = vld [vmem:[%s3589_s1 + $0x58] sm:$0xff]  ;;  %v216_v20 = vld [vmem:[%s3590_s2 + $0x8] sm:$0xff] }
   0x6   :  { %2160 = vmatpush1.bf16.msra.mxu1 %v2159_v8  ;;  %v40_v19 = vld [vmem:[%s3589_s1 + $0x78] sm:$0xff]  ;;  %v220_v21 = vld [vmem:[%s3590_s2 + $0x28] sm:$0xff]  ;;  %v215_v22 = vld [vmem:[%s3590_s2] sm:$0xff]  ;;  %v2167_v27 = vpack.c.bf16 %v31_v16, %v27_v15 }
   0x7   :  { %2162 = vmatprep.subr.bf16.mxu1 %v2161_v9  ;;  %v219_v23 = vld [vmem:[%s3590_s2 + $0x20] sm:$0xff]  ;;  %v2971_v25 = vpack.c.bf16 %v220_v21, %v216_v20  ;;  %v35_v28 = vld [vmem:[%s3589_s1 + $0x50] sm:$0xff]  ;;  %v224_v29 = vld [vmem:[%s3590_s2 + $0x48] sm:$0xff]  ;;  %v2169_v31 = vpack.c.bf16 %v40_v19, %v36_v18 }
   0x8   :  { %v24_v24 = vld [vmem:[%s3588_s0] sm:$0xff]  ;;  %v2973_v26 = vpack.c.bf16 %v219_v23, %v215_v22  ;;  %v228_v30 = vld [vmem:[%s3590_s2 + $0x68] sm:$0xff]  ;;  %v39_v32 = vld [vmem:[%s3589_s1 + $0x70] sm:$0xff] }
   0x9   :  { %2174 = vmatprep.subr.bf16.mxu0 %v2971_v25  ;;  %v2988_v33 = vpack.c.bf16 %v228_v30, %v224_v29  ;;  %v223_v34 = vld [vmem:[%s3590_s2 + $0x40] sm:$0xff]  ;;  %v218_v36 = vld [vmem:[%s3590_s2 + $0x18] sm:$0xff]  ;;  %v232_v39 = vld [vmem:[%s3590_s2 + $0x88] sm:$0xff]  ;;  %v2171_v42 = vpack.c.bf16 %v39_v32, %v35_v28 }
   0xa   :  { %2164 = vmatpush1.bf16.msra.mxu1 %v2163_v14  ;;  %v227_v35 = vld [vmem:[%s3590_s2 + $0x60] sm:$0xff]  ;;  %2176 = vmatpush1.bf16.msra.mxu0 %v2973_v26  ;;  %v222_v37 = vld [vmem:[%s3590_s2 + $0x38] sm:$0xff]  ;;  %v236_v40 = vld [vmem:[%s3590_s2 + $0xa8] sm:$0xff] }
   0xb   :  { %2166 = vmatprep.subr.bf16.mxu1 %v2165_v17  ;;  %v3003_v38 = vpack.c.bf16 %v227_v35, %v223_v34  ;;  %2178 = vmatprep.subr.bf16.mxu0 %v2988_v33  ;;  %v231_v41 = vld [vmem:[%s3590_s2 + $0x80] sm:$0xff]  ;;  %v3017_v43 = vpack.c.bf16 %v236_v40, %v232_v39  ;;  %v3022_v45 = vpack.c.bf16 %v222_v37, %v218_v36  ;;  %v217_v46 = vld [vmem:[%s3590_s2 + $0x10] sm:$0xff]  ;;  %v240_v48 = vld [vmem:[%s3590_s2 + $0xc8] sm:$0xff] }
   0xc   :  { %v235_v44 = vld [vmem:[%s3590_s2 + $0xa0] sm:$0xff]  ;;  %v221_v47 = vld [vmem:[%s3590_s2 + $0x30] sm:$0xff]  ;;  %v226_v49 = vld [vmem:[%s3590_s2 + $0x58] sm:$0xff] }
   0xd   :  { %2078 = vmatmul.mubr.msk.f32.vlgmr.msra.gmra.mrb[0].mxu1 %vm63_vm0, %v24_v24  ;;  %v230_v50 = vld [vmem:[%s3590_s2 + $0x78] sm:$0xff]  ;;  %v3040_v51 = vpack.c.bf16 %v235_v44, %v231_v41  ;;  %v244_v52 = vld [vmem:[%s3590_s2 + $0xe8] sm:$0xff]  ;;  %v239_v54 = vld [vmem:[%s3590_s2 + $0xc0] sm:$0xff]  ;;  %v3054_v56 = vpack.c.bf16 %v221_v47, %v217_v46 }
   0xe   :  { %2168 = vmatpush1.bf16.msra.mxu1 %v2167_v27  ;;  %202 = vmatprep.mubr.f32.mxu1 %v2870_v7  ;;  %v3046_v53 = vpack.c.bf16 %v244_v52, %v240_v48  ;;  %v243_v55 = vld [vmem:[%s3590_s2 + $0xe0] sm:$0xff]  ;;  %v248_v57 = vld [vmem:[%s3590_s2 + $0x108] sm:$0xff]  ;;  %v3063_v59 = vpack.c.bf16 %v230_v50, %v226_v49  ;;  %v225_v60 = vld [vmem:[%s3590_s2 + $0x50] sm:$0xff] }
   0xf   :  { %2170 = vmatprep.subr.bf16.mxu1 %v2169_v31  ;;  %2180 = vmatpush1.bf16.msra.mxu0 %v3003_v38  ;;  %v252_v58 = vld [vmem:[%s3590_s2 + $0x128] sm:$0xff]  ;;  %v229_v61 = vld [vmem:[%s3590_s2 + $0x70] sm:$0xff]  ;;  %v234_v62 = vld [vmem:[%s3590_s2 + $0x98] sm:$0xff]  ;;  %v3078_v0 = vpack.c.bf16 %v243_v55, %v239_v54 }
  0x10   :  { %2182 = vmatprep.subr.bf16.mxu0 %v3017_v43  ;;  %v238_v63 = vld [vmem:[%s3590_s2 + $0xb8] sm:$0xff]  ;;  %v3082_v1 = vpack.c.bf16 %v252_v58, %v248_v57  ;;  %v247_v2 = vld [vmem:[%s3590_s2 + $0x100] sm:$0xff]  ;;  %v3091_v4 = vpack.c.bf16 %v229_v61, %v225_v60  ;;  %v256_v5 = vld [vmem:[%s3590_s2 + $0x148] sm:$0xff] }
  0x11   :  { %v251_v3 = vld [vmem:[%s3590_s2 + $0x120] sm:$0xff]  ;;  %v260_v6 = vld [vmem:[%s3590_s2 + $0x168] sm:$0xff]  ;;  %v3101_v8 = vpack.c.bf16 %v238_v63, %v234_v62  ;;  %v233_v9 = vld [vmem:[%s3590_s2 + $0x90] sm:$0xff] }
  0x12   :  { %2172 = vmatpush1.bf16.msra.mxu1 %v2171_v42  ;;  %v237_v10 = vld [vmem:[%s3590_s2 + $0xb0] sm:$0xff]  ;;  %v242_v11 = vld [vmem:[%s3590_s2 + $0xd8] sm:$0xff]  ;;  %v3116_v13 = vpack.c.bf16 %v251_v3, %v247_v2  ;;  %v3119_v14 = vpack.c.bf16 %v260_v6, %v256_v5  ;;  %v255_v15 = vld [vmem:[%s3590_s2 + $0x140] sm:$0xff] }
  0x13   :  { %2206 = vmatprep.subr.bf16.mxu1 %v3022_v45  ;;  %2184 = vmatpush1.bf16.msra.mxu0 %v3040_v51  ;;  %v246_v12 = vld [vmem:[%s3590_s2 + $0xf8] sm:$0xff]  ;;  %v259_v16 = vld [vmem:[%s3590_s2 + $0x160] sm:$0xff]  ;;  %v3128_v17 = vpack.c.bf16 %v237_v10, %v233_v9  ;;  %v264_v18 = vld [vmem:[%s3590_s2 + $0x188] sm:$0xff] }
  0x14   :  { %2186 = vmatprep.subr.bf16.mxu0 %v3046_v53  ;;  %v268_v19 = vld [vmem:[%s3590_s2 + $0x1a8] sm:$0xff]  ;;  %v3137_v20 = vpack.c.bf16 %v246_v12, %v242_v11  ;;  %v241_v21 = vld [vmem:[%s3590_s2 + $0xd0] sm:$0xff]  ;;  %v250_v23 = vld [vmem:[%s3590_s2 + $0x118] sm:$0xff]  ;;  %v3152_v27 = vpack.c.bf16 %v259_v16, %v255_v15 }
  0x15   :  { %2079 = vmatmul.mubr.msk.f32.vlgmr.msra.gmra.mrb[2].mxu1 %vm63_vm0, %v24_v24  ;;  %v245_v22 = vld [vmem:[%s3590_s2 + $0xf0] sm:$0xff]  ;;  %v254_v24 = vld [vmem:[%s3590_s2 + $0x138] sm:$0xff]  ;;  %v3155_v28 = vpack.c.bf16 %v268_v19, %v264_v18  ;;  %v263_v29 = vld [vmem:[%s3590_s2 + $0x180] sm:$0xff] }
  0x16   :  { %2208 = vmatpush1.bf16.msra.mxu1 %v3054_v56  ;;  %417 = vmatprep.mubr.f32.mxu1 %v2870_v7  ;;  %v267_v30 = vld [vmem:[%s3590_s2 + $0x1a0] sm:$0xff] }
  0x17   :  { %2210 = vmatprep.subr.bf16.mxu1 %v3063_v59  ;;  %2188 = vmatpush1.bf16.msra.mxu0 %v3078_v0 }
  0x18   :  { %2190 = vmatprep.subr.bf16.mxu0 %v3082_v1 }
  0x1a   :  { %2212 = vmatpush1.bf16.msra.mxu1 %v3091_v4 }
  0x1b   :  { %2214 = vmatprep.subr.bf16.mxu1 %v3101_v8  ;;  %2192 = vmatpush1.bf16.msra.mxu0 %v3116_v13 }
  0x1c   :  { %2194 = vmatprep.subr.bf16.mxu0 %v3119_v14 }
  0x1d   :  { %11 = vsyncpa [#allocation7], 0  ;;  %v3164_v31 = vpack.c.bf16 %v245_v22, %v241_v21  ;;  %v272_v32 = vld [vmem:[%s3590_s2 + $0x1c8] sm:$0xff]  ;;  %v3173_v35 = vpack.c.bf16 %v254_v24, %v250_v23  ;;  %v249_v36 = vld [vmem:[%s3590_s2 + $0x110] sm:$0xff]  ;;  %v3188_v41 = vpack.c.bf16 %v267_v30, %v263_v29  ;;  %v43_v11 = vlaneseq  ;;  %s2874_s10 = smov [#allocation6]  }
  0x1e   :  { %2216 = vmatpush1.bf16.msra.mxu1 %v3128_v17  ;;  %v276_v34 = vld [vmem:[%s3590_s2 + $0x1e8] sm:$0xff]  ;;  %v253_v37 = vld [vmem:[%s3590_s2 + $0x130] sm:$0xff]  ;;  %v258_v39 = vld [vmem:[%s3590_s2 + $0x158] sm:$0xff]  ;;  %vm2873_vm1 = vmmov 0   ;;  %s2070_s11 = sshll.u32 %s2874_s10, 4  ;;  %s2071_s11 = int_to_ptr.vmem [resolvable:$true] %s2070_s11 }
  0x1f   :  { %2218 = vmatprep.subr.bf16.mxu1 %v3137_v20  ;;  %2196 = vmatpush1.bf16.msra.mxu0 %v3152_v27  ;;  %v262_v40 = vld [vmem:[%s3590_s2 + $0x178] sm:$0xff]  ;;  %v3191_v42 = vpack.c.bf16 %v276_v34, %v272_v32  ;;  %v271_v44 = vld [vmem:[%s3590_s2 + $0x1c0] sm:$0xff]  ;;  %v3200_v47 = vpack.c.bf16 %v253_v37, %v249_v36  ;;  %v257_v49 = vld [vmem:[%s3590_s2 + $0x150] sm:$0xff]  ;;  %v44_v12 = vshrl.u32 %v43_v11, 7  ;;  %p2851_p1 = scmp.lt.s32.totalorder %s2071_s11, %s2071_s11 }
  0x20   :  { %2198 = vmatprep.subr.bf16.mxu0 %v3155_v28  ;;  %v275_v46 = vld [vmem:[%s3590_s2 + $0x1e0] sm:$0xff]  ;;  %v3203_v48 = vpack.c.bf16 %v262_v40, %v258_v39  ;;  %v261_v50 = vld [vmem:[%s3590_s2 + $0x170] sm:$0xff]  ;;  %v266_v52 = vld [vmem:[%s3590_s2 + $0x198] sm:$0xff] }
  0x21   :  { %v270_v54 = vld [vmem:[%s3590_s2 + $0x1b8] sm:$0xff]  ;;  %v3218_v55 = vpack.c.bf16 %v275_v46, %v271_v44  ;;  %v3222_v57 = vpack.c.bf16 %v261_v50, %v257_v49  ;;  %v265_v60 = vld [vmem:[%s3590_s2 + $0x190] sm:$0xff]  ;;  %v279_v2 = vld [vmem:[#allocation4] sm:$0x1]  ;;  %v45_v15 = vsub.s32 0, %v44_v12  ;;  %v49_v18 = vsub.s32 1, %v44_v12 }
  0x22   :  { %2220 = vmatpush1.bf16.msra.mxu1 %v3164_v31  ;;  %v3225_v58 = vpack.c.bf16 %v270_v54, %v266_v52  ;;  %v269_v61 = vld [vmem:[%s3590_s2 + $0x1b0] sm:$0xff]  ;;  %v274_v62 = vld [vmem:[%s3590_s2 + $0x1d8] sm:$0xff]  ;;  %v41_v16 = vld [vmem:[%s3591_s3] sm:$0xf]  ;;  %v53_v29 = vsub.s32 2, %v44_v12  ;;  %v57_v32 = vsub.s32 3, %v44_v12 }
  0x23   :  { %2222 = vmatprep.subr.bf16.mxu1 %v3173_v35  ;;  %2200 = vmatpush1.bf16.msra.mxu0 %v3188_v41  ;;  %v278_v63 = vld [vmem:[%s3590_s2 + $0x1f8] sm:$0xff]  ;;  %v3242_v3 = vpack.c.bf16 %v269_v61, %v265_v60  ;;  %v273_v6 = vld [vmem:[%s3590_s2 + $0x1d0] sm:$0xff]  ;;  %v46_v19 = vrot.slane %v41_v16, %v45_v15  ;;  %v50_v21 = vrot.slane %v41_v16, %v49_v18  ;;  %v2871_v46 = vmov 1966171168  }
  0x24   :  { %2202 = vmatprep.subr.bf16.mxu0 %v3191_v42  ;;  %v3245_v5 = vpack.c.bf16 %v278_v63, %v274_v62  ;;  %v277_v9 = vld [vmem:[%s3590_s2 + $0x1f0] sm:$0xff]  ;;  %v54_v34 = vrot.slane %v41_v16, %v53_v29  ;;  %v58_v36 = vrot.slane %v41_v16, %v57_v32  ;;  %v431_v49 = vunpack.c.l.s4 %v2871_v46 }
  0x25   :  { %v3257_v10 = vpack.c.bf16 %v277_v9, %v273_v6 }
  0x26   :  { %2224 = vmatpush1.bf16.msra.mxu1 %v3200_v47  ;;  %v432_v60 = vunpack.c.0.s8 %v431_v49 }
  0x27   :  { %2226 = vmatprep.subr.bf16.mxu1 %v3203_v48  ;;  %2204 = vmatpush1.bf16.msra.mxu0 %v3218_v55 }
  0x28   :  { %2238 = vmatprep.subr.bf16.mxu0 %v2971_v25  ;;  %v3296_v61 = vsub.s32 %v432_v60, %v44_v12 }
  0x2a   :  { %2228 = vmatpush1.bf16.msra.mxu1 %v3222_v57  ;;  %347 = vmatmul.mubr.f32.vlgmr.msra.gmra.mrb[0].mxu0 %v279_v2 }
  0x2b   :  { %2230 = vmatprep.subr.bf16.mxu1 %v3225_v58  ;;  %2240 = vmatpush1.bf16.msra.mxu0 %v2973_v26 }
  0x2c   :  { %556 = vmatprep.mubr.f32.mxu0 %v2870_v7  ;;  %2242 = vmatprep.subr.bf16.mxu0 %v2988_v33 }
  0x2e   :  { %2232 = vmatpush1.bf16.msra.mxu1 %v3242_v3 }
  0x2f   :  { %2234 = vmatprep.subr.bf16.mxu1 %v3245_v5  ;;  %2244 = vmatpush1.bf16.msra.mxu0 %v3003_v38 }
  0x30   :  { %2246 = vmatprep.subr.bf16.mxu0 %v3017_v43 }
  0x32   :  { %2236 = vmatpush1.bf16.msra.mxu1 %v3257_v10 }
  0x33   :  { %2270 = vmatprep.subr.bf16.mxu1 %v3022_v45  ;;  %2248 = vmatpush1.bf16.msra.mxu0 %v3040_v51 }
  0x34   :  { %2250 = vmatprep.subr.bf16.mxu0 %v3046_v53 }
  0x35   :  { %418 = vmatmul.mubr.f32.vlgmr.msra.gmra.mrb[4].mxu1 %v279_v2 }
  0x36   :  { %2272 = vmatpush1.bf16.msra.mxu1 %v3054_v56  ;;  %627 = vmatprep.mubr.f32.mxu1 %v2870_v7 }
  0x37   :  { %2274 = vmatprep.subr.bf16.mxu1 %v3063_v59  ;;  %2252 = vmatpush1.bf16.msra.mxu0 %v3078_v0 }
  0x38   :  { %2254 = vmatprep.subr.bf16.mxu0 %v3082_v1 }
  0x3a   :  { %2276 = vmatpush1.bf16.msra.mxu1 %v3091_v4 }
  0x3b   :  { %2278 = vmatprep.subr.bf16.mxu1 %v3101_v8  ;;  %2256 = vmatpush1.bf16.msra.mxu0 %v3116_v13 }
  0x3c   :  { %2258 = vmatprep.subr.bf16.mxu0 %v3119_v14 }
  0x3e   :  { %2280 = vmatpush1.bf16.msra.mxu1 %v3128_v17 }
  0x3f   :  { %2282 = vmatprep.subr.bf16.mxu1 %v3137_v20  ;;  %2260 = vmatpush1.bf16.msra.mxu0 %v3152_v27 }
  0x40   :  { %2262 = vmatprep.subr.bf16.mxu0 %v3155_v28 }
  0x42   :  { %2284 = vmatpush1.bf16.msra.mxu1 %v3164_v31 }
  0x43   :  { %2286 = vmatprep.subr.bf16.mxu1 %v3173_v35  ;;  %2264 = vmatpush1.bf16.msra.mxu0 %v3188_v41 }
  0x44   :  { %2266 = vmatprep.subr.bf16.mxu0 %v3191_v42 }
  0x46   :  { %2288 = vmatpush1.bf16.msra.mxu1 %v3200_v47 }
  0x47   :  { %2290 = vmatprep.subr.bf16.mxu1 %v3203_v48  ;;  %2268 = vmatpush1.bf16.msra.mxu0 %v3218_v55 }
  0x48   :  { %2302 = vmatprep.subr.bf16.mxu0 %v2971_v25 }
  0x4a   :  { %2292 = vmatpush1.bf16.msra.mxu1 %v3222_v57 }
  0x4b   :  { %2294 = vmatprep.subr.bf16.mxu1 %v3225_v58 }
  0x4e   :  { %2296 = vmatpush1.bf16.msra.mxu1 %v3242_v3 }
  0x4f   :  { %2298 = vmatprep.subr.bf16.mxu1 %v3245_v5 }
  0x52   :  { %2300 = vmatpush1.bf16.msra.mxu1 %v3257_v10 }
  0x53   :  { %2334 = vmatprep.subr.bf16.mxu1 %v3022_v45 }
  0xe0   :  { %v133_v22 = vpop.f32.mrb[0].mxu1 }
  0xe1   :  { %v134_v23 = vadd.f32 %v133_v22, %v46_v19  ;;  %v135_v24 = vpop.f32.mrb[1].mxu1 }
  0xe2   :  { %v136_v30 = vadd.f32 %v135_v24, %v50_v21 }
  0xe3   :  { %209 = vst [vmem:[#allocation2] sm:$0xff] %v134_v23 }
  0xe4   :  { %210 = vst [vmem:[#allocation2 + $0x8] sm:$0xff] %v136_v30 }
  0xe8   :  { %v204_v37 = vpop.f32.mrb[2].mxu1 }
  0xe9   :  { %v205_v39 = vadd.f32 %v204_v37, %v54_v34  ;;  %v206_v40 = vpop.f32.mrb[3].mxu1 }
  0xea   :  { %v207_v44 = vadd.f32 %v206_v40, %v58_v36 }
  0xeb   :  { %211 = vst [vmem:[#allocation2 + $0x10] sm:$0xff] %v205_v39  ;;  %v280_v39 = vld [vmem:[#allocation5] sm:$0x1] }
  0xec   :  { %212 = vst [vmem:[#allocation2 + $0x18] sm:$0xff] %v207_v44 }
  0xf3   :  { %v281_v16 = vld [vmem:[#allocation2] ss:$8 sm:$0xf] }
  0xfd   :  { %v348_v50 = vpop.f32.mrb[0].mxu0 }
  0xfe   :  { %v350_v52 = vpop.f32.mrb[1].mxu0 }
  0xff   :  { %v428_v54 = vcombine.low %v348_v50, %v350_v52 }
 0x101   :  { %v436_v2 = vrot.slane %v428_v54, %v3296_v61 }
 0x108   :  { %v419_v62 = vpop.f32.mrb[4].mxu1 }
 0x109   :  { %v421_v63 = vpop.f32.mrb[5].mxu1 }
 0x10a   :  { %v429_v6 = vcombine.low %v419_v62, %v421_v63 }
 0x10c   :  { %v443_v9 = vrot.slane %v429_v6, %v3296_v61 }
 0x10e   :  { %v444_v11 = vcombine.low %v436_v2, %v443_v9 }
 0x110   :  { %v451_v15 = vrot.slane %v444_v11, %v3296_v61 }
 0x112   :  { %v453_v18 = vadd.f32 %v451_v15, %v281_v16 }
 0x114   :  { %v2080_v19 = vmul.f32 -1.442695, %v453_v18  ;;  %v461_v21 = vrot.slane %v453_v18, 1  ;;  %v472_v23 = vrot.slane %v453_v18, 3  ;;  %v469_v29 = vrot.slane %v453_v18, 2 }
 0x116   :  { %2714 = vpow2.f32 %v2080_v19  ;;  %v2081_v22 = vmul.f32 -1.442695, %v461_v21  ;;  %v2082_v12 = vmul.f32 -1.442695, %v472_v23 }
 0x117   :  { %v491_v23 = vld [vmem:[#allocation2 + $0x1] ss:$8 sm:$0xf] }
 0x118   :  { %2716 = vpow2.f32 %v2081_v22 }
 0x119   :  { %2718 = vpow2.f32 %v2082_v12 }
 0x120   :  { %v2715_v24 = vpop.eup %2714 }
 0x121   :  { %v457_v30 = vadd.f32 1.0, %v2715_v24 }
 0x122   :  { %v2717_v32 = vpop.eup %2716 }
 0x123   :  { %2720 = vrcp.f32 %v457_v30  ;;  %v466_v34 = vadd.f32 1.0, %v2717_v32  ;;  %v2719_v36 = vpop.eup %2718 }
 0x124   :  { %2722 = vtanh.f32 %v469_v29  ;;  %v477_v46 = vadd.f32 1.0, %v2719_v36 }
 0x125   :  { %2724 = vrcp.f32 %v466_v34 }
 0x126   :  { %2726 = vrcp.f32 %v477_v46 }
 0x12d   :  { %v2721_v37 = vpop.eup %2720 }
 0x12e   :  { %v2723_v40 = vpop.eup %2722 }
 0x12f   :  { %v2725_v44 = vpop.eup %2724  ;;  %v481_v50 = vmul.f32 %v2723_v40, %v2721_v37 }
 0x130   :  { %v480_v49 = vmul.f32 %v2725_v44, %v280_v39  ;;  %v2727_v54 = vpop.eup %2726 }
 0x132   :  { %v482_v52 = vadd.f32 %v481_v50, %v480_v49 }
 0x134   :  { %2728 = vtanh.f32 %v482_v52  ;;  %486 = vst [vmem:[#allocation5] sm:$0x1] %v482_v52 }
 0x13e   :  { %v2729_v60 = vpop.eup %2728 }
 0x13f   :  { %v484_v62 = vmul.f32 %v2729_v60, %v2727_v54  ;;  %v489_v54 = vld [vmem:[#allocation5] sm:$0x1] }
 0x141   :  { %485 = vst [vmem:[#allocation4] sm:$0x1] %v484_v62  ;;  %487 = vst [vmem:[#allocation3] sm:$0x1] %v484_v62 }
 0x148   :  { %v488_v63 = vld [vmem:[#allocation4] sm:$0x1] }
 0x149   :  { %557 = vmatmul.mubr.f32.vlgmr.msra.gmra.mrb[2].mxu0 %v488_v63  ;;  %628 = vmatmul.mubr.f32.vlgmr.msra.gmra.mrb[6].mxu1 %v488_v63 }
 0x14a   :  { %2304 = vmatpush1.bf16.msra.mxu0 %v2973_v26  ;;  %2336 = vmatpush1.bf16.msra.mxu1 %v3054_v56 }
 0x14b   :  { %2306 = vmatprep.subr.bf16.mxu0 %v2988_v33  ;;  %2338 = vmatprep.subr.bf16.mxu1 %v3063_v59 }
 0x14c   :  { %766 = vmatprep.mubr.f32.mxu0 %v2870_v7  ;;  %837 = vmatprep.mubr.f32.mxu1 %v2870_v7 }
 0x14e   :  { %2308 = vmatpush1.bf16.msra.mxu0 %v3003_v38  ;;  %2340 = vmatpush1.bf16.msra.mxu1 %v3091_v4 }
 0x14f   :  { %2310 = vmatprep.subr.bf16.mxu0 %v3017_v43  ;;  %2342 = vmatprep.subr.bf16.mxu1 %v3101_v8 }
 0x152   :  { %2312 = vmatpush1.bf16.msra.mxu0 %v3040_v51  ;;  %2344 = vmatpush1.bf16.msra.mxu1 %v3128_v17 }
 0x153   :  { %2314 = vmatprep.subr.bf16.mxu0 %v3046_v53  ;;  %2346 = vmatprep.subr.bf16.mxu1 %v3137_v20 }
 0x156   :  { %2316 = vmatpush1.bf16.msra.mxu0 %v3078_v0  ;;  %2348 = vmatpush1.bf16.msra.mxu1 %v3164_v31 }
 0x157   :  { %2318 = vmatprep.subr.bf16.mxu0 %v3082_v1  ;;  %2350 = vmatprep.subr.bf16.mxu1 %v3173_v35 }
 0x15a   :  { %2320 = vmatpush1.bf16.msra.mxu0 %v3116_v13  ;;  %2352 = vmatpush1.bf16.msra.mxu1 %v3200_v47 }
 0x15b   :  { %2322 = vmatprep.subr.bf16.mxu0 %v3119_v14  ;;  %2354 = vmatprep.subr.bf16.mxu1 %v3203_v48 }
 0x15e   :  { %2324 = vmatpush1.bf16.msra.mxu0 %v3152_v27  ;;  %2356 = vmatpush1.bf16.msra.mxu1 %v3222_v57 }
 0x15f   :  { %2326 = vmatprep.subr.bf16.mxu0 %v3155_v28  ;;  %2358 = vmatprep.subr.bf16.mxu1 %v3225_v58 }
 0x162   :  { %2328 = vmatpush1.bf16.msra.mxu0 %v3188_v41  ;;  %2360 = vmatpush1.bf16.msra.mxu1 %v3242_v3 }
 0x163   :  { %2330 = vmatprep.subr.bf16.mxu0 %v3191_v42  ;;  %2362 = vmatprep.subr.bf16.mxu1 %v3245_v5 }
 0x166   :  { %2332 = vmatpush1.bf16.msra.mxu0 %v3218_v55  ;;  %2364 = vmatpush1.bf16.msra.mxu1 %v3257_v10 }
 0x167   :  { %2366 = vmatprep.subr.bf16.mxu0 %v2971_v25  ;;  %2398 = vmatprep.subr.bf16.mxu1 %v3022_v45 }
 0x21c   :  { %v558_v2 = vpop.f32.mrb[2].mxu0  ;;  %v629_v6 = vpop.f32.mrb[6].mxu1 }
 0x21d   :  { %v560_v9 = vpop.f32.mrb[3].mxu0  ;;  %v631_v11 = vpop.f32.mrb[7].mxu1 }
 0x21e   :  { %v638_v15 = vcombine.low %v558_v2, %v560_v9  ;;  %v639_v16 = vcombine.low %v629_v6, %v631_v11 }
 0x220   :  { %v646_v18 = vrot.slane %v638_v15, %v3296_v61  ;;  %v653_v19 = vrot.slane %v639_v16, %v3296_v61 }
 0x222   :  { %v654_v21 = vcombine.low %v646_v18, %v653_v19 }
 0x224   :  { %v661_v22 = vrot.slane %v654_v21, %v3296_v61 }
 0x226   :  { %v663_v12 = vadd.f32 %v661_v22, %v491_v23 }
 0x228   :  { %v2083_v24 = vmul.f32 -1.442695, %v663_v12  ;;  %v671_v29 = vrot.slane %v663_v12, 1  ;;  %v682_v32 = vrot.slane %v663_v12, 3  ;;  %v679_v37 = vrot.slane %v663_v12, 2 }
 0x22a   :  { %2730 = vpow2.f32 %v2083_v24  ;;  %v2084_v30 = vmul.f32 -1.442695, %v671_v29  ;;  %v2085_v34 = vmul.f32 -1.442695, %v682_v32 }
 0x22b   :  { %v701_v32 = vld [vmem:[#allocation2 + $0x2] ss:$8 sm:$0xf] }
 0x22c   :  { %2732 = vpow2.f32 %v2084_v30 }
 0x22d   :  { %2734 = vpow2.f32 %v2085_v34 }
 0x234   :  { %v2731_v36 = vpop.eup %2730 }
 0x235   :  { %v667_v39 = vadd.f32 1.0, %v2731_v36 }
 0x236   :  { %v2733_v40 = vpop.eup %2732 }
 0x237   :  { %2736 = vrcp.f32 %v667_v39  ;;  %v676_v44 = vadd.f32 1.0, %v2733_v40  ;;  %v2735_v46 = vpop.eup %2734 }
 0x238   :  { %2738 = vtanh.f32 %v679_v37  ;;  %v687_v60 = vadd.f32 1.0, %v2735_v46 }
 0x239   :  { %2740 = vrcp.f32 %v676_v44 }
 0x23a   :  { %2742 = vrcp.f32 %v687_v60 }
 0x241   :  { %v2737_v49 = vpop.eup %2736 }
 0x242   :  { %v2739_v50 = vpop.eup %2738 }
 0x243   :  { %v2741_v52 = vpop.eup %2740  ;;  %v691_v63 = vmul.f32 %v2739_v50, %v2737_v49 }
 0x244   :  { %v690_v62 = vmul.f32 %v2741_v52, %v489_v54  ;;  %v2743_v6 = vpop.eup %2742 }
 0x246   :  { %v692_v2 = vadd.f32 %v691_v63, %v690_v62 }
 0x248   :  { %2744 = vtanh.f32 %v692_v2  ;;  %696 = vst [vmem:[#allocation5] sm:$0x1] %v692_v2 }
 0x252   :  { %v2745_v9 = vpop.eup %2744 }
 0x253   :  { %v694_v11 = vmul.f32 %v2745_v9, %v2743_v6  ;;  %v699_v6 = vld [vmem:[#allocation5] sm:$0x1] }
 0x255   :  { %695 = vst [vmem:[#allocation4] sm:$0x1] %v694_v11  ;;  %697 = vst [vmem:[#allocation3 + $0x1] sm:$0x1] %v694_v11 }
 0x25c   :  { %v698_v15 = vld [vmem:[#allocation4] sm:$0x1] }
 0x25d   :  { %767 = vmatmul.mubr.f32.vlgmr.msra.gmra.mrb[4].mxu0 %v698_v15  ;;  %838 = vmatmul.mubr.f32.vlgmr.msra.gmra.mrb[8].mxu1 %v698_v15 }
 0x25e   :  { %2368 = vmatpush1.bf16.msra.mxu0 %v2973_v26  ;;  %2400 = vmatpush1.bf16.msra.mxu1 %v3054_v56 }
 0x25f   :  { %2370 = vmatprep.subr.bf16.mxu0 %v2988_v33  ;;  %2402 = vmatprep.subr.bf16.mxu1 %v3063_v59 }
 0x260   :  { %976 = vmatprep.mubr.f32.mxu0 %v2870_v7  ;;  %1047 = vmatprep.mubr.f32.mxu1 %v2870_v7 }
 0x262   :  { %2372 = vmatpush1.bf16.msra.mxu0 %v3003_v38  ;;  %2404 = vmatpush1.bf16.msra.mxu1 %v3091_v4 }
 0x263   :  { %2374 = vmatprep.subr.bf16.mxu0 %v3017_v43  ;;  %2406 = vmatprep.subr.bf16.mxu1 %v3101_v8 }
 0x266   :  { %2376 = vmatpush1.bf16.msra.mxu0 %v3040_v51  ;;  %2408 = vmatpush1.bf16.msra.mxu1 %v3128_v17 }
 0x267   :  { %2378 = vmatprep.subr.bf16.mxu0 %v3046_v53  ;;  %2410 = vmatprep.subr.bf16.mxu1 %v3137_v20 }
 0x26a   :  { %2380 = vmatpush1.bf16.msra.mxu0 %v3078_v0  ;;  %2412 = vmatpush1.bf16.msra.mxu1 %v3164_v31 }
 0x26b   :  { %2382 = vmatprep.subr.bf16.mxu0 %v3082_v1  ;;  %2414 = vmatprep.subr.bf16.mxu1 %v3173_v35 }
 0x26e   :  { %2384 = vmatpush1.bf16.msra.mxu0 %v3116_v13  ;;  %2416 = vmatpush1.bf16.msra.mxu1 %v3200_v47 }
 0x26f   :  { %2386 = vmatprep.subr.bf16.mxu0 %v3119_v14  ;;  %2418 = vmatprep.subr.bf16.mxu1 %v3203_v48 }
 0x272   :  { %2388 = vmatpush1.bf16.msra.mxu0 %v3152_v27  ;;  %2420 = vmatpush1.bf16.msra.mxu1 %v3222_v57 }
 0x273   :  { %2390 = vmatprep.subr.bf16.mxu0 %v3155_v28  ;;  %2422 = vmatprep.subr.bf16.mxu1 %v3225_v58 }
 0x276   :  { %2392 = vmatpush1.bf16.msra.mxu0 %v3188_v41  ;;  %2424 = vmatpush1.bf16.msra.mxu1 %v3242_v3 }
 0x277   :  { %2394 = vmatprep.subr.bf16.mxu0 %v3191_v42  ;;  %2426 = vmatprep.subr.bf16.mxu1 %v3245_v5 }
 0x27a   :  { %2396 = vmatpush1.bf16.msra.mxu0 %v3218_v55  ;;  %2428 = vmatpush1.bf16.msra.mxu1 %v3257_v10 }
 0x27b   :  { %2430 = vmatprep.subr.bf16.mxu0 %v2971_v25  ;;  %2462 = vmatprep.subr.bf16.mxu1 %v3022_v45 }
 0x330   :  { %v768_v16 = vpop.f32.mrb[4].mxu0  ;;  %v839_v18 = vpop.f32.mrb[8].mxu1 }
 0x331   :  { %v770_v19 = vpop.f32.mrb[5].mxu0  ;;  %v841_v21 = vpop.f32.mrb[9].mxu1 }
 0x332   :  { %v848_v22 = vcombine.low %v768_v16, %v770_v19  ;;  %v849_v23 = vcombine.low %v839_v18, %v841_v21 }
 0x334   :  { %v856_v12 = vrot.slane %v848_v22, %v3296_v61  ;;  %v863_v24 = vrot.slane %v849_v23, %v3296_v61 }
 0x336   :  { %v864_v29 = vcombine.low %v856_v12, %v863_v24 }
 0x338   :  { %v871_v30 = vrot.slane %v864_v29, %v3296_v61 }
 0x33a   :  { %v873_v34 = vadd.f32 %v871_v30, %v701_v32 }
 0x33c   :  { %v2086_v36 = vmul.f32 -1.442695, %v873_v34  ;;  %v881_v37 = vrot.slane %v873_v34, 1  ;;  %v892_v40 = vrot.slane %v873_v34, 3  ;;  %v889_v49 = vrot.slane %v873_v34, 2 }
 0x33e   :  { %2746 = vpow2.f32 %v2086_v36  ;;  %v2087_v39 = vmul.f32 -1.442695, %v881_v37  ;;  %v2088_v44 = vmul.f32 -1.442695, %v892_v40 }
 0x33f   :  { %v911_v40 = vld [vmem:[#allocation2 + $0x3] ss:$8 sm:$0xf] }
 0x340   :  { %2748 = vpow2.f32 %v2087_v39 }
 0x341   :  { %2750 = vpow2.f32 %v2088_v44 }
 0x348   :  { %v2747_v46 = vpop.eup %2746 }
 0x349   :  { %v877_v50 = vadd.f32 1.0, %v2747_v46 }
 0x34a   :  { %v2749_v52 = vpop.eup %2748 }
 0x34b   :  { %2752 = vrcp.f32 %v877_v50  ;;  %v886_v54 = vadd.f32 1.0, %v2749_v52  ;;  %v2751_v60 = vpop.eup %2750 }
 0x34c   :  { %2754 = vtanh.f32 %v889_v49  ;;  %v897_v9 = vadd.f32 1.0, %v2751_v60 }
 0x34d   :  { %2756 = vrcp.f32 %v886_v54 }
 0x34e   :  { %2758 = vrcp.f32 %v897_v9 }
 0x355   :  { %v2753_v62 = vpop.eup %2752 }
 0x356   :  { %v2755_v63 = vpop.eup %2754 }
 0x357   :  { %v2757_v2 = vpop.eup %2756  ;;  %v901_v15 = vmul.f32 %v2755_v63, %v2753_v62 }
 0x358   :  { %v900_v11 = vmul.f32 %v2757_v2, %v699_v6  ;;  %v2759_v18 = vpop.eup %2758 }
 0x35a   :  { %v902_v16 = vadd.f32 %v901_v15, %v900_v11 }
 0x35c   :  { %2760 = vtanh.f32 %v902_v16  ;;  %906 = vst [vmem:[#allocation5] sm:$0x1] %v902_v16 }
 0x366   :  { %v2761_v19 = vpop.eup %2760 }
 0x367   :  { %v904_v21 = vmul.f32 %v2761_v19, %v2759_v18  ;;  %v909_v18 = vld [vmem:[#allocation5] sm:$0x1] }
 0x369   :  { %907 = vst [vmem:[#allocation3 + $0x2] sm:$0x1] %v904_v21  ;;  %905 = vst [vmem:[#allocation4] sm:$0x1] %v904_v21 }
 0x370   :  { %v908_v22 = vld [vmem:[#allocation4] sm:$0x1] }
 0x371   :  { %977 = vmatmul.mubr.f32.vlgmr.msra.gmra.mrb[6].mxu0 %v908_v22  ;;  %1048 = vmatmul.mubr.f32.vlgmr.msra.gmra.mrb[10].mxu1 %v908_v22 }
 0x372   :  { %2432 = vmatpush1.bf16.msra.mxu0 %v2973_v26  ;;  %2464 = vmatpush1.bf16.msra.mxu1 %v3054_v56 }
 0x373   :  { %2434 = vmatprep.subr.bf16.mxu0 %v2988_v33  ;;  %2466 = vmatprep.subr.bf16.mxu1 %v3063_v59 }
 0x374   :  { %1186 = vmatprep.mubr.f32.mxu0 %v2870_v7  ;;  %1257 = vmatprep.mubr.f32.mxu1 %v2870_v7 }
 0x376   :  { %2436 = vmatpush1.bf16.msra.mxu0 %v3003_v38  ;;  %2468 = vmatpush1.bf16.msra.mxu1 %v3091_v4 }
 0x377   :  { %2438 = vmatprep.subr.bf16.mxu0 %v3017_v43  ;;  %2470 = vmatprep.subr.bf16.mxu1 %v3101_v8 }
 0x37a   :  { %2440 = vmatpush1.bf16.msra.mxu0 %v3040_v51  ;;  %2472 = vmatpush1.bf16.msra.mxu1 %v3128_v17 }
 0x37b   :  { %2442 = vmatprep.subr.bf16.mxu0 %v3046_v53  ;;  %2474 = vmatprep.subr.bf16.mxu1 %v3137_v20 }
 0x37e   :  { %2444 = vmatpush1.bf16.msra.mxu0 %v3078_v0  ;;  %2476 = vmatpush1.bf16.msra.mxu1 %v3164_v31 }
 0x37f   :  { %2446 = vmatprep.subr.bf16.mxu0 %v3082_v1  ;;  %2478 = vmatprep.subr.bf16.mxu1 %v3173_v35 }
 0x382   :  { %2448 = vmatpush1.bf16.msra.mxu0 %v3116_v13  ;;  %2480 = vmatpush1.bf16.msra.mxu1 %v3200_v47 }
 0x383   :  { %2450 = vmatprep.subr.bf16.mxu0 %v3119_v14  ;;  %2482 = vmatprep.subr.bf16.mxu1 %v3203_v48 }
 0x386   :  { %2452 = vmatpush1.bf16.msra.mxu0 %v3152_v27  ;;  %2484 = vmatpush1.bf16.msra.mxu1 %v3222_v57 }
 0x387   :  { %2454 = vmatprep.subr.bf16.mxu0 %v3155_v28  ;;  %2486 = vmatprep.subr.bf16.mxu1 %v3225_v58 }
 0x38a   :  { %2456 = vmatpush1.bf16.msra.mxu0 %v3188_v41  ;;  %2488 = vmatpush1.bf16.msra.mxu1 %v3242_v3 }
 0x38b   :  { %2458 = vmatprep.subr.bf16.mxu0 %v3191_v42  ;;  %2490 = vmatprep.subr.bf16.mxu1 %v3245_v5 }
 0x38e   :  { %2460 = vmatpush1.bf16.msra.mxu0 %v3218_v55  ;;  %2492 = vmatpush1.bf16.msra.mxu1 %v3257_v10 }
 0x38f   :  { %2494 = vmatprep.subr.bf16.mxu0 %v2971_v25  ;;  %2526 = vmatprep.subr.bf16.mxu1 %v3022_v45 }
 0x444   :  { %v978_v23 = vpop.f32.mrb[6].mxu0  ;;  %v1049_v12 = vpop.f32.mrb[10].mxu1 }
 0x445   :  { %v980_v24 = vpop.f32.mrb[7].mxu0  ;;  %v1051_v29 = vpop.f32.mrb[11].mxu1 }
 0x446   :  { %v1058_v30 = vcombine.low %v978_v23, %v980_v24  ;;  %v1059_v32 = vcombine.low %v1049_v12, %v1051_v29 }
 0x448   :  { %v1066_v34 = vrot.slane %v1058_v30, %v3296_v61  ;;  %v1073_v36 = vrot.slane %v1059_v32, %v3296_v61 }
 0x44a   :  { %v1074_v37 = vcombine.low %v1066_v34, %v1073_v36 }
 0x44c   :  { %v1081_v39 = vrot.slane %v1074_v37, %v3296_v61 }
 0x44e   :  { %v1083_v44 = vadd.f32 %v1081_v39, %v911_v40 }
 0x450   :  { %v2089_v46 = vmul.f32 -1.442695, %v1083_v44  ;;  %v1091_v49 = vrot.slane %v1083_v44, 1  ;;  %v1102_v52 = vrot.slane %v1083_v44, 3  ;;  %v1099_v62 = vrot.slane %v1083_v44, 2 }
 0x452   :  { %2762 = vpow2.f32 %v2089_v46  ;;  %v2090_v50 = vmul.f32 -1.442695, %v1091_v49  ;;  %v2091_v54 = vmul.f32 -1.442695, %v1102_v52 }
 0x453   :  { %v1121_v52 = vld [vmem:[#allocation2 + $0x4] ss:$8 sm:$0xf] }
 0x454   :  { %2764 = vpow2.f32 %v2090_v50 }
 0x455   :  { %2766 = vpow2.f32 %v2091_v54 }
 0x45c   :  { %v2763_v60 = vpop.eup %2762 }
 0x45d   :  { %v1087_v63 = vadd.f32 1.0, %v2763_v60 }
 0x45e   :  { %v2765_v2 = vpop.eup %2764 }
 0x45f   :  { %2768 = vrcp.f32 %v1087_v63  ;;  %v1096_v6 = vadd.f32 1.0, %v2765_v2  ;;  %v2767_v9 = vpop.eup %2766 }
 0x460   :  { %2770 = vtanh.f32 %v1099_v62  ;;  %v1107_v19 = vadd.f32 1.0, %v2767_v9 }
 0x461   :  { %2772 = vrcp.f32 %v1096_v6 }
 0x462   :  { %2774 = vrcp.f32 %v1107_v19 }
 0x469   :  { %v2769_v11 = vpop.eup %2768 }
 0x46a   :  { %v2771_v15 = vpop.eup %2770 }
 0x46b   :  { %v2773_v16 = vpop.eup %2772  ;;  %v1111_v22 = vmul.f32 %v2771_v15, %v2769_v11 }
 0x46c   :  { %v1110_v21 = vmul.f32 %v2773_v16, %v909_v18  ;;  %v2775_v12 = vpop.eup %2774 }
 0x46e   :  { %v1112_v23 = vadd.f32 %v1111_v22, %v1110_v21 }
 0x470   :  { %2776 = vtanh.f32 %v1112_v23  ;;  %1116 = vst [vmem:[#allocation5] sm:$0x1] %v1112_v23 }
 0x47a   :  { %v2777_v24 = vpop.eup %2776 }
 0x47b   :  { %v1114_v29 = vmul.f32 %v2777_v24, %v2775_v12  ;;  %v1119_v12 = vld [vmem:[#allocation5] sm:$0x1] }
 0x47d   :  { %1117 = vst [vmem:[#allocation3 + $0x3] sm:$0x1] %v1114_v29  ;;  %1115 = vst [vmem:[#allocation4] sm:$0x1] %v1114_v29 }
 0x484   :  { %v1118_v30 = vld [vmem:[#allocation4] sm:$0x1] }
 0x485   :  { %1187 = vmatmul.mubr.f32.vlgmr.msra.gmra.mrb[8].mxu0 %v1118_v30  ;;  %1258 = vmatmul.mubr.f32.vlgmr.msra.gmra.mrb[12].mxu1 %v1118_v30 }
 0x486   :  { %2496 = vmatpush1.bf16.msra.mxu0 %v2973_v26  ;;  %2528 = vmatpush1.bf16.msra.mxu1 %v3054_v56 }
 0x487   :  { %2498 = vmatprep.subr.bf16.mxu0 %v2988_v33  ;;  %2530 = vmatprep.subr.bf16.mxu1 %v3063_v59 }
 0x488   :  { %1396 = vmatprep.mubr.f32.mxu0 %v2870_v7  ;;  %1467 = vmatprep.mubr.f32.mxu1 %v2870_v7 }
 0x48a   :  { %2500 = vmatpush1.bf16.msra.mxu0 %v3003_v38  ;;  %2532 = vmatpush1.bf16.msra.mxu1 %v3091_v4 }
 0x48b   :  { %2502 = vmatprep.subr.bf16.mxu0 %v3017_v43  ;;  %2534 = vmatprep.subr.bf16.mxu1 %v3101_v8 }
 0x48e   :  { %2504 = vmatpush1.bf16.msra.mxu0 %v3040_v51  ;;  %2536 = vmatpush1.bf16.msra.mxu1 %v3128_v17 }
 0x48f   :  { %2506 = vmatprep.subr.bf16.mxu0 %v3046_v53  ;;  %2538 = vmatprep.subr.bf16.mxu1 %v3137_v20 }
 0x492   :  { %2508 = vmatpush1.bf16.msra.mxu0 %v3078_v0  ;;  %2540 = vmatpush1.bf16.msra.mxu1 %v3164_v31 }
 0x493   :  { %2510 = vmatprep.subr.bf16.mxu0 %v3082_v1  ;;  %2542 = vmatprep.subr.bf16.mxu1 %v3173_v35 }
 0x496   :  { %2512 = vmatpush1.bf16.msra.mxu0 %v3116_v13  ;;  %2544 = vmatpush1.bf16.msra.mxu1 %v3200_v47 }
 0x497   :  { %2514 = vmatprep.subr.bf16.mxu0 %v3119_v14  ;;  %2546 = vmatprep.subr.bf16.mxu1 %v3203_v48 }
 0x49a   :  { %2516 = vmatpush1.bf16.msra.mxu0 %v3152_v27  ;;  %2548 = vmatpush1.bf16.msra.mxu1 %v3222_v57 }
 0x49b   :  { %2518 = vmatprep.subr.bf16.mxu0 %v3155_v28  ;;  %2550 = vmatprep.subr.bf16.mxu1 %v3225_v58 }
 0x49e   :  { %2520 = vmatpush1.bf16.msra.mxu0 %v3188_v41  ;;  %2552 = vmatpush1.bf16.msra.mxu1 %v3242_v3 }
 0x49f   :  { %2522 = vmatprep.subr.bf16.mxu0 %v3191_v42  ;;  %2554 = vmatprep.subr.bf16.mxu1 %v3245_v5 }
 0x4a2   :  { %2524 = vmatpush1.bf16.msra.mxu0 %v3218_v55  ;;  %2556 = vmatpush1.bf16.msra.mxu1 %v3257_v10 }
 0x4a3   :  { %2558 = vmatprep.subr.bf16.mxu0 %v2971_v25  ;;  %2590 = vmatprep.subr.bf16.mxu1 %v3022_v45 }
 0x558   :  { %v1188_v32 = vpop.f32.mrb[8].mxu0  ;;  %v1259_v34 = vpop.f32.mrb[12].mxu1 }
 0x559   :  { %v1190_v36 = vpop.f32.mrb[9].mxu0  ;;  %v1261_v37 = vpop.f32.mrb[13].mxu1 }
 0x55a   :  { %v1268_v39 = vcombine.low %v1188_v32, %v1190_v36  ;;  %v1269_v40 = vcombine.low %v1259_v34, %v1261_v37 }
 0x55c   :  { %v1276_v44 = vrot.slane %v1268_v39, %v3296_v61  ;;  %v1283_v46 = vrot.slane %v1269_v40, %v3296_v61 }
 0x55e   :  { %v1284_v49 = vcombine.low %v1276_v44, %v1283_v46 }
 0x560   :  { %v1291_v50 = vrot.slane %v1284_v49, %v3296_v61 }
 0x562   :  { %v1293_v54 = vadd.f32 %v1291_v50, %v1121_v52 }
 0x564   :  { %v2092_v60 = vmul.f32 -1.442695, %v1293_v54  ;;  %v1301_v62 = vrot.slane %v1293_v54, 1  ;;  %v1312_v2 = vrot.slane %v1293_v54, 3  ;;  %v1309_v11 = vrot.slane %v1293_v54, 2 }
 0x566   :  { %2778 = vpow2.f32 %v2092_v60  ;;  %v2093_v63 = vmul.f32 -1.442695, %v1301_v62  ;;  %v2094_v6 = vmul.f32 -1.442695, %v1312_v2 }
 0x567   :  { %v1331_v2 = vld [vmem:[#allocation2 + $0x5] ss:$8 sm:$0xf] }
 0x568   :  { %2780 = vpow2.f32 %v2093_v63 }
 0x569   :  { %2782 = vpow2.f32 %v2094_v6 }
 0x570   :  { %v2779_v9 = vpop.eup %2778 }
 0x571   :  { %v1297_v15 = vadd.f32 1.0, %v2779_v9 }
 0x572   :  { %v2781_v16 = vpop.eup %2780 }
 0x573   :  { %2784 = vrcp.f32 %v1297_v15  ;;  %v1306_v18 = vadd.f32 1.0, %v2781_v16  ;;  %v2783_v19 = vpop.eup %2782 }
 0x574   :  { %2786 = vtanh.f32 %v1309_v11  ;;  %v1317_v24 = vadd.f32 1.0, %v2783_v19 }
 0x575   :  { %2788 = vrcp.f32 %v1306_v18 }
 0x576   :  { %2790 = vrcp.f32 %v1317_v24 }
 0x57d   :  { %v2785_v21 = vpop.eup %2784 }
 0x57e   :  { %v2787_v22 = vpop.eup %2786 }
 0x57f   :  { %v2789_v23 = vpop.eup %2788  ;;  %v1321_v30 = vmul.f32 %v2787_v22, %v2785_v21 }
 0x580   :  { %v1320_v29 = vmul.f32 %v2789_v23, %v1119_v12  ;;  %v2791_v34 = vpop.eup %2790 }
 0x582   :  { %v1322_v32 = vadd.f32 %v1321_v30, %v1320_v29 }
 0x584   :  { %2792 = vtanh.f32 %v1322_v32  ;;  %1326 = vst [vmem:[#allocation5] sm:$0x1] %v1322_v32 }
 0x58b   :  { %v1329_v30 = vld [vmem:[#allocation5] sm:$0x1] }
 0x58e   :  { %v2793_v36 = vpop.eup %2792 }
 0x58f   :  { %v1324_v37 = vmul.f32 %v2793_v36, %v2791_v34 }
 0x591   :  { %1327 = vst [vmem:[#allocation3 + $0x4] sm:$0x1] %v1324_v37  ;;  %1325 = vst [vmem:[#allocation4] sm:$0x1] %v1324_v37 }
 0x598   :  { %v1328_v39 = vld [vmem:[#allocation4] sm:$0x1] }
 0x599   :  { %1397 = vmatmul.mubr.f32.vlgmr.msra.gmra.mrb[10].mxu0 %v1328_v39  ;;  %1468 = vmatmul.mubr.f32.vlgmr.msra.gmra.mrb[14].mxu1 %v1328_v39 }
 0x59a   :  { %2560 = vmatpush1.bf16.msra.mxu0 %v2973_v26  ;;  %2592 = vmatpush1.bf16.msra.mxu1 %v3054_v56 }
 0x59b   :  { %2562 = vmatprep.subr.bf16.mxu0 %v2988_v33  ;;  %2594 = vmatprep.subr.bf16.mxu1 %v3063_v59 }
 0x59c   :  { %1606 = vmatprep.mubr.f32.mxu0 %v2870_v7  ;;  %1677 = vmatprep.mubr.f32.mxu1 %v2870_v7 }
 0x59e   :  { %2564 = vmatpush1.bf16.msra.mxu0 %v3003_v38  ;;  %2596 = vmatpush1.bf16.msra.mxu1 %v3091_v4 }
 0x59f   :  { %2566 = vmatprep.subr.bf16.mxu0 %v3017_v43  ;;  %2598 = vmatprep.subr.bf16.mxu1 %v3101_v8 }
 0x5a2   :  { %2568 = vmatpush1.bf16.msra.mxu0 %v3040_v51  ;;  %2600 = vmatpush1.bf16.msra.mxu1 %v3128_v17 }
 0x5a3   :  { %2570 = vmatprep.subr.bf16.mxu0 %v3046_v53  ;;  %2602 = vmatprep.subr.bf16.mxu1 %v3137_v20 }
 0x5a6   :  { %2572 = vmatpush1.bf16.msra.mxu0 %v3078_v0  ;;  %2604 = vmatpush1.bf16.msra.mxu1 %v3164_v31 }
 0x5a7   :  { %2574 = vmatprep.subr.bf16.mxu0 %v3082_v1  ;;  %2606 = vmatprep.subr.bf16.mxu1 %v3173_v35 }
 0x5aa   :  { %2576 = vmatpush1.bf16.msra.mxu0 %v3116_v13  ;;  %2608 = vmatpush1.bf16.msra.mxu1 %v3200_v47 }
 0x5ab   :  { %2578 = vmatprep.subr.bf16.mxu0 %v3119_v14  ;;  %2610 = vmatprep.subr.bf16.mxu1 %v3203_v48 }
 0x5ae   :  { %2580 = vmatpush1.bf16.msra.mxu0 %v3152_v27  ;;  %2612 = vmatpush1.bf16.msra.mxu1 %v3222_v57 }
 0x5af   :  { %2582 = vmatprep.subr.bf16.mxu0 %v3155_v28  ;;  %2614 = vmatprep.subr.bf16.mxu1 %v3225_v58 }
 0x5b2   :  { %2584 = vmatpush1.bf16.msra.mxu0 %v3188_v41  ;;  %2616 = vmatpush1.bf16.msra.mxu1 %v3242_v3 }
 0x5b3   :  { %2586 = vmatprep.subr.bf16.mxu0 %v3191_v42  ;;  %2618 = vmatprep.subr.bf16.mxu1 %v3245_v5 }
 0x5b6   :  { %2588 = vmatpush1.bf16.msra.mxu0 %v3218_v55  ;;  %2620 = vmatpush1.bf16.msra.mxu1 %v3257_v10 }
 0x5b7   :  { %2622 = vmatprep.subr.bf16.mxu0 %v2971_v25  ;;  %2654 = vmatprep.subr.bf16.mxu1 %v3022_v45 }
 0x66c   :  { %v1398_v40 = vpop.f32.mrb[10].mxu0  ;;  %v1469_v44 = vpop.f32.mrb[14].mxu1 }
 0x66d   :  { %v1400_v46 = vpop.f32.mrb[11].mxu0  ;;  %v1471_v49 = vpop.f32.mrb[15].mxu1 }
 0x66e   :  { %v1478_v50 = vcombine.low %v1398_v40, %v1400_v46  ;;  %v1479_v52 = vcombine.low %v1469_v44, %v1471_v49 }
 0x670   :  { %v1486_v54 = vrot.slane %v1478_v50, %v3296_v61  ;;  %v1493_v60 = vrot.slane %v1479_v52, %v3296_v61 }
 0x672   :  { %v1494_v62 = vcombine.low %v1486_v54, %v1493_v60 }
 0x674   :  { %v1501_v63 = vrot.slane %v1494_v62, %v3296_v61  ;;  %v1959_v62 = vld [vmem:[%s3592_s4] sm:$0xff] }
 0x676   :  { %v1503_v6 = vadd.f32 %v1501_v63, %v1331_v2  ;;  %v1960_v63 = vld [vmem:[%s3592_s4 + $0x8] sm:$0xff] }
 0x677   :  { %v2686_v2 = vpack.c.bf16 %v1960_v63, %v1959_v62 }
 0x678   :  { %v2095_v9 = vmul.f32 -1.442695, %v1503_v6  ;;  %v1511_v11 = vrot.slane %v1503_v6, 1  ;;  %v1522_v45 = vrot.slane %v1503_v6, 3  ;;  %v1519_v18 = vrot.slane %v1503_v6, 2 }
 0x679   :  { %v2872_v6 = vmov 0.0|0.0  }
 0x67a   :  { %2794 = vpow2.f32 %v2095_v9  ;;  %v2096_v25 = vmul.f32 -1.442695, %v1511_v11  ;;  %v2097_v15 = vmul.f32 -1.442695, %v1522_v45  ;;  %v1961_v9 = vld [vmem:[%s3592_s4 + $0x10] sm:$0xff]  ;;  %v1962_v11 = vld [vmem:[%s3592_s4 + $0x18] sm:$0xff] }
 0x67b   :  { %v1963_v45 = vld [vmem:[%s3592_s4 + $0x20] sm:$0xff] }
 0x67c   :  { %2796 = vpow2.f32 %v2096_v25  ;;  %v2689_v25 = vpack.c.bf16 %v1962_v11, %v1961_v9 }
 0x67d   :  { %2798 = vpow2.f32 %v2097_v15  ;;  %v1964_v15 = vld [vmem:[%s3592_s4 + $0x28] sm:$0xff] }
 0x684   :  { %v2795_v16 = vpop.eup %2794 }
 0x685   :  { %v1507_v19 = vadd.f32 1.0, %v2795_v16  ;;  %v2692_v16 = vpack.c.bf16 %v1964_v15, %v1963_v45 }
 0x686   :  { %v2797_v21 = vpop.eup %2796 }
 0x687   :  { %2800 = vrcp.f32 %v1507_v19  ;;  %v1516_v22 = vadd.f32 1.0, %v2797_v21  ;;  %v2799_v23 = vpop.eup %2798  ;;  %v1966_v19 = vld [vmem:[%s3592_s4 + $0x38] sm:$0xff] }
 0x688   :  { %2802 = vtanh.f32 %v1519_v18  ;;  %v1527_v32 = vadd.f32 1.0, %v2799_v23  ;;  %v1965_v18 = vld [vmem:[%s3592_s4 + $0x30] sm:$0xff]  ;;  %v1968_v23 = vld [vmem:[%s3592_s4 + $0x48] sm:$0xff] }
 0x689   :  { %2804 = vrcp.f32 %v1516_v22  ;;  %v2695_v21 = vpack.c.bf16 %v1966_v19, %v1965_v18  ;;  %v1967_v22 = vld [vmem:[%s3592_s4 + $0x40] sm:$0xff] }
 0x68a   :  { %2806 = vrcp.f32 %v1527_v32  ;;  %v1971_v32 = vld [vmem:[%s3592_s4 + $0x60] sm:$0xff] }
 0x691   :  { %v2801_v12 = vpop.eup %2800 }
 0x692   :  { %v2803_v24 = vpop.eup %2802 }
 0x693   :  { %v2805_v29 = vpop.eup %2804  ;;  %v1531_v36 = vmul.f32 %v2803_v24, %v2801_v12  ;;  %v2698_v12 = vpack.c.bf16 %v1968_v23, %v1967_v22  ;;  %v1969_v24 = vld [vmem:[%s3592_s4 + $0x50] sm:$0xff] }
 0x694   :  { %v1530_v34 = vmul.f32 %v2805_v29, %v1329_v30  ;;  %v2807_v39 = vpop.eup %2806  ;;  %v1970_v29 = vld [vmem:[%s3592_s4 + $0x58] sm:$0xff] }
 0x695   :  { %v2701_v30 = vpack.c.bf16 %v1970_v29, %v1969_v24 }
 0x696   :  { %v1532_v37 = vadd.f32 %v1531_v36, %v1530_v34  ;;  %v1972_v34 = vld [vmem:[%s3592_s4 + $0x68] sm:$0xff] }
 0x697   :  { %v2704_v36 = vpack.c.bf16 %v1972_v34, %v1971_v32 }
 0x698   :  { %2808 = vtanh.f32 %v1532_v37  ;;  %1536 = vst [vmem:[#allocation5] sm:$0x1] %v1532_v37  ;;  %v1973_v37 = vld [vmem:[%s3592_s4 + $0x70] sm:$0xff] }
 0x6a2   :  { %v2809_v40 = vpop.eup %2808 }
 0x6a3   :  { %v1534_v44 = vmul.f32 %v2809_v40, %v2807_v39  ;;  %v1974_v39 = vld [vmem:[%s3592_s4 + $0x78] sm:$0xff] }
 0x6a4   :  { %v2707_v40 = vpack.c.bf16 %v1974_v39, %v1973_v37 }
 0x6a5   :  { %1537 = vst [vmem:[#allocation3 + $0x5] sm:$0x1] %v1534_v44  ;;  %1535 = vst [vmem:[#allocation4] sm:$0x1] %v1534_v44 }
 0x6ac   :  { %v1538_v46 = vld [vmem:[#allocation4] sm:$0x1] }
 0x6ad   :  { %1607 = vmatmul.mubr.f32.vlgmr.msra.gmra.mrb[12].mxu0 %v1538_v46  ;;  %1678 = vmatmul.mubr.f32.vlgmr.msra.gmra.mrb[16].mxu1 %v1538_v46 }
 0x6ae   :  { %2624 = vmatpush1.bf16.msra.mxu0 %v2973_v26  ;;  %2656 = vmatpush1.bf16.msra.mxu1 %v3054_v56 }
 0x6af   :  { %2626 = vmatprep.subr.bf16.mxu0 %v2988_v33  ;;  %2658 = vmatprep.subr.bf16.mxu1 %v3063_v59 }
 0x6b0   :  { %1816 = vmatprep.mubr.f32.mxu0 %v2870_v7  ;;  %1887 = vmatprep.mubr.f32.mxu1 %v2870_v7 }
 0x6b2   :  { %2628 = vmatpush1.bf16.msra.mxu0 %v3003_v38  ;;  %2660 = vmatpush1.bf16.msra.mxu1 %v3091_v4  ;;  %v1541_v4 = vld [vmem:[#allocation2 + $0x6] ss:$8 sm:$0xf] }
 0x6b3   :  { %2630 = vmatprep.subr.bf16.mxu0 %v3017_v43  ;;  %2662 = vmatprep.subr.bf16.mxu1 %v3101_v8 }
 0x6b6   :  { %2632 = vmatpush1.bf16.msra.mxu0 %v3040_v51  ;;  %2664 = vmatpush1.bf16.msra.mxu1 %v3128_v17 }
 0x6b7   :  { %2634 = vmatprep.subr.bf16.mxu0 %v3046_v53  ;;  %2666 = vmatprep.subr.bf16.mxu1 %v3137_v20 }
 0x6ba   :  { %2636 = vmatpush1.bf16.msra.mxu0 %v3078_v0  ;;  %2668 = vmatpush1.bf16.msra.mxu1 %v3164_v31 }
 0x6bb   :  { %2638 = vmatprep.subr.bf16.mxu0 %v3082_v1  ;;  %2670 = vmatprep.subr.bf16.mxu1 %v3173_v35 }
 0x6be   :  { %2640 = vmatpush1.bf16.msra.mxu0 %v3116_v13  ;;  %2672 = vmatpush1.bf16.msra.mxu1 %v3200_v47 }
 0x6bf   :  { %2642 = vmatprep.subr.bf16.mxu0 %v3119_v14  ;;  %2674 = vmatprep.subr.bf16.mxu1 %v3203_v48 }
 0x6c2   :  { %2644 = vmatpush1.bf16.msra.mxu0 %v3152_v27  ;;  %2676 = vmatpush1.bf16.msra.mxu1 %v3222_v57 }
 0x6c3   :  { %2646 = vmatprep.subr.bf16.mxu0 %v3155_v28  ;;  %2678 = vmatprep.subr.bf16.mxu1 %v3225_v58  ;;  %v1539_v58 = vld [vmem:[#allocation5] sm:$0x1] }
 0x6c6   :  { %2648 = vmatpush1.bf16.msra.mxu0 %v3188_v41  ;;  %2680 = vmatpush1.bf16.msra.mxu1 %v3242_v3 }
 0x6c7   :  { %2650 = vmatprep.subr.bf16.mxu0 %v3191_v42  ;;  %2682 = vmatprep.subr.bf16.mxu1 %v3245_v5 }
 0x6ca   :  { %2652 = vmatpush1.bf16.msra.mxu0 %v3218_v55  ;;  %2684 = vmatpush1.bf16.msra.mxu1 %v3257_v10 }
 0x6cb   :  { %2685 = vmatprep.subr.bf16.mxu0 %v2872_v6 }
 0x780   :  { %v1608_v26 = vpop.f32.mrb[12].mxu0  ;;  %v1679_v33 = vpop.f32.mrb[16].mxu1 }
 0x781   :  { %v1610_v38 = vpop.f32.mrb[13].mxu0  ;;  %v1681_v43 = vpop.f32.mrb[17].mxu1 }
 0x782   :  { %v1688_v51 = vcombine.low %v1608_v26, %v1610_v38  ;;  %v1689_v53 = vcombine.low %v1679_v33, %v1681_v43 }
 0x784   :  { %v1696_v56 = vrot.slane %v1688_v51, %v3296_v61  ;;  %v1703_v59 = vrot.slane %v1689_v53, %v3296_v61 }
 0x786   :  { %v1704_v0 = vcombine.low %v1696_v56, %v1703_v59 }
 0x788   :  { %v1711_v1 = vrot.slane %v1704_v0, %v3296_v61  ;;  %v1751_v0 = vld [vmem:[#allocation2 + $0x7] ss:$8 sm:$0xf] }
 0x78a   :  { %v1713_v8 = vadd.f32 %v1711_v1, %v1541_v4 }
 0x78c   :  { %v2098_v13 = vmul.f32 -1.442695, %v1713_v8  ;;  %v1721_v14 = vrot.slane %v1713_v8, 1  ;;  %v1732_v20 = vrot.slane %v1713_v8, 3  ;;  %v1729_v31 = vrot.slane %v1713_v8, 2 }
 0x78e   :  { %2810 = vpow2.f32 %v2098_v13  ;;  %v2099_v17 = vmul.f32 -1.442695, %v1721_v14  ;;  %v2100_v27 = vmul.f32 -1.442695, %v1732_v20 }
 0x790   :  { %2812 = vpow2.f32 %v2099_v17 }
 0x791   :  { %2814 = vpow2.f32 %v2100_v27 }
 0x798   :  { %v2811_v28 = vpop.eup %2810 }
 0x799   :  { %v1717_v35 = vadd.f32 1.0, %v2811_v28 }
 0x79a   :  { %v2813_v41 = vpop.eup %2812 }
 0x79b   :  { %2816 = vrcp.f32 %v1717_v35  ;;  %v1726_v42 = vadd.f32 1.0, %v2813_v41  ;;  %v2815_v47 = vpop.eup %2814 }
 0x79c   :  { %2818 = vtanh.f32 %v1729_v31  ;;  %v1737_v3 = vadd.f32 1.0, %v2815_v47 }
 0x79d   :  { %2820 = vrcp.f32 %v1726_v42 }
 0x79e   :  { %2822 = vrcp.f32 %v1737_v3 }
 0x7a5   :  { %v2817_v48 = vpop.eup %2816 }
 0x7a6   :  { %v2819_v55 = vpop.eup %2818 }
 0x7a7   :  { %v2821_v57 = vpop.eup %2820  ;;  %v1741_v10 = vmul.f32 %v2819_v55, %v2817_v48 }
 0x7a8   :  { %v1740_v5 = vmul.f32 %v2821_v57, %v1539_v58  ;;  %v2823_v50 = vpop.eup %2822 }
 0x7aa   :  { %v1742_v49 = vadd.f32 %v1741_v10, %v1740_v5 }
 0x7ac   :  { %2824 = vtanh.f32 %v1742_v49  ;;  %1746 = vst [vmem:[#allocation5] sm:$0x1] %v1742_v49 }
 0x7b3   :  { %v1749_v47 = vld [vmem:[#allocation5] sm:$0x1] }
 0x7b6   :  { %v2825_v52 = vpop.eup %2824 }
 0x7b7   :  { %v1744_v54 = vmul.f32 %v2825_v52, %v2823_v50  ;;  %v2104_v50 = vld [vmem:[%s3593_s5] ss:$0 sm:$0xff]  ;;  %s2846_s5 = scalar_lea.vmem %s2071_s11, 128 }
 0x7b8   :  { %p2847_p0 = scmp.ne.s32.totalorder %s2071_s11, %s2846_s5  ;;  %p2852_p2 = scmp.lt.s32.totalorder %s2846_s5, %s2846_s5 }
 0x7b9   :  { %1747 = vst [vmem:[#allocation3 + $0x6] sm:$0x1] %v1744_v54  ;;  %1745 = vst [vmem:[#allocation4] sm:$0x1] %v1744_v54 }
 0x7ba   :  { %p2853_p3 = por %p2852_p2, %p2851_p1 }
 0x7bc   :  { %p2854_p4 = pnand %p2853_p3, %p2847_p0 }
 0x7c0   :  { %v1748_v60 = vld [vmem:[#allocation4] sm:$0x1] }
 0x7c1   :  { %1817 = vmatmul.mubr.f32.vlgmr.msra.gmra.mrb[14].mxu0 %v1748_v60  ;;  %1888 = vmatmul.mubr.f32.vlgmr.msra.gmra.mrb[18].mxu1 %v1748_v60 }
 0x7c2   :  { %2687 = vmatpush3.bf16.msra.mxu0 %v2686_v2  ;;  %2154 = vmatprep.mubr.msk.f32.mxu0 %vm2873_vm1, %v2870_v7 }
 0x7c3   :  { %2688 = vmatprep.subr.bf16.mxu0 %v2872_v6 }
 0x7c6   :  { %2690 = vmatpush3.bf16.msra.mxu0 %v2689_v25 }
 0x7c7   :  { %2691 = vmatprep.subr.bf16.mxu0 %v2872_v6 }
 0x7ca   :  { %2693 = vmatpush3.bf16.msra.mxu0 %v2692_v16 }
 0x7cb   :  { %2694 = vmatprep.subr.bf16.mxu0 %v2872_v6 }
 0x7ce   :  { %2696 = vmatpush3.bf16.msra.mxu0 %v2695_v21 }
 0x7cf   :  { %2697 = vmatprep.subr.bf16.mxu0 %v2872_v6 }
 0x7d2   :  { %2699 = vmatpush3.bf16.msra.mxu0 %v2698_v12 }
 0x7d3   :  { %2700 = vmatprep.subr.bf16.mxu0 %v2872_v6 }
 0x7d6   :  { %2702 = vmatpush3.bf16.msra.mxu0 %v2701_v30 }
 0x7d7   :  { %2703 = vmatprep.subr.bf16.mxu0 %v2872_v6 }
 0x7da   :  { %2705 = vmatpush3.bf16.msra.mxu0 %v2704_v36 }
 0x7db   :  { %2706 = vmatprep.subr.bf16.mxu0 %v2872_v6 }
 0x7de   :  { %2708 = vmatpush3.bf16.msra.mxu0 %v2707_v40 }
 0x894   :  { %v1818_v44 = vpop.f32.mrb[14].mxu0  ;;  %v1889_v46 = vpop.f32.mrb[18].mxu1 }
 0x895   :  { %v1820_v26 = vpop.f32.mrb[15].mxu0  ;;  %v1891_v33 = vpop.f32.mrb[19].mxu1 }
 0x896   :  { %v1898_v38 = vcombine.low %v1818_v44, %v1820_v26  ;;  %v1899_v43 = vcombine.low %v1889_v46, %v1891_v33 }
 0x898   :  { %v1906_v51 = vrot.slane %v1898_v38, %v3296_v61  ;;  %v1913_v53 = vrot.slane %v1899_v43, %v3296_v61 }
 0x89a   :  { %v1914_v56 = vcombine.low %v1906_v51, %v1913_v53 }
 0x89c   :  { %v1921_v59 = vrot.slane %v1914_v56, %v3296_v61 }
 0x89e   :  { %v1923_v1 = vadd.f32 %v1921_v59, %v1751_v0 }
 0x8a0   :  { %v2101_v7 = vmul.f32 -1.442695, %v1923_v1  ;;  %v1931_v4 = vrot.slane %v1923_v1, 1  ;;  %v1942_v13 = vrot.slane %v1923_v1, 3  ;;  %v1939_v20 = vrot.slane %v1923_v1, 2 }
 0x8a2   :  { %2826 = vpow2.f32 %v2101_v7  ;;  %v2102_v8 = vmul.f32 -1.442695, %v1931_v4  ;;  %v2103_v14 = vmul.f32 -1.442695, %v1942_v13 }
 0x8a4   :  { %2828 = vpow2.f32 %v2102_v8 }
 0x8a5   :  { %2830 = vpow2.f32 %v2103_v14 }
 0x8ac   :  { %v2827_v17 = vpop.eup %2826 }
 0x8ad   :  { %v1927_v27 = vadd.f32 1.0, %v2827_v17 }
 0x8ae   :  { %v2829_v28 = vpop.eup %2828 }
 0x8af   :  { %2832 = vrcp.f32 %v1927_v27  ;;  %v1936_v31 = vadd.f32 1.0, %v2829_v28  ;;  %v2831_v35 = vpop.eup %2830 }
 0x8b0   :  { %2834 = vtanh.f32 %v1939_v20  ;;  %v1947_v48 = vadd.f32 1.0, %v2831_v35 }
 0x8b1   :  { %2836 = vrcp.f32 %v1936_v31 }
 0x8b2   :  { %2838 = vrcp.f32 %v1947_v48 }
 0x8b9   :  { %v2833_v61 = vpop.eup %2832 }
 0x8ba   :  { %v2835_v41 = vpop.eup %2834 }
 0x8bb   :  { %v2837_v42 = vpop.eup %2836  ;;  %v1951_v57 = vmul.f32 %v2835_v41, %v2833_v61 }
 0x8bc   :  { %v1950_v55 = vmul.f32 %v2837_v42, %v1749_v47  ;;  %v2839_v3 = vpop.eup %2838 }
 0x8be   :  { %v1952_v58 = vadd.f32 %v1951_v57, %v1950_v55 }
 0x8c0   :  { %2840 = vtanh.f32 %v1952_v58  ;;  %1956 = vst [vmem:[#allocation5] sm:$0x1] %v1952_v58 }
 0x8ca   :  { %v2841_v5 = vpop.eup %2840 }
 0x8cb   :  { %v1954_v10 = vmul.f32 %v2841_v5, %v2839_v3 }
 0x8cd   :  { %1955 = vst [vmem:[#allocation4] sm:$0x1] %v1954_v10  ;;  %1957 = vst [vmem:[#allocation3 + $0x7] sm:$0x1] %v1954_v10 }
 0x8d4   :  { %v1958_v49 = vld [vmem:[#allocation3] sm:$0xff] }
 0x8d5   :  { %2155 = vmatmul.mubr.f32.vlgmr.msra.gmra.mrb[16].mxu0 %v1958_v49 }
 0x9a8   :  { %v2048_v52 = vpop.f32.mrb[16].mxu0 }
 0x9a9   :  { %v2049_v54 = vadd.f32 %v2104_v50, %v2048_v52  ;;  %v2156_v60 = vpop.f32.mrb[17].mxu0 }
 0x9ab   :  { %2052 = vmax.xlane.f32.xlu0 %v2049_v54 }
 0xa38   :  { %v2053_v62 = vpop.xlane.xlu0 %2052 }
 0xa39   :  { %v2054_v63 = vsub.f32 %v2049_v54, %v2053_v62 }
 0xa3b   :  { %v2055_v2 = vmul.f32 1.442695, %v2054_v63 }
 0xa3d   :  { %2842 = vpow2.f32 %v2055_v2 }
 0xa47   :  { %v2843_v6 = vpop.eup %2842 }
 0xa48   :  { %2057 = vadd.xlane.f32.xlu0 %v2843_v6 }
 0xad5   :  { %v2058_v9 = vpop.xlane.xlu0 %2057 }
 0xad6   :  { %2844 = vlog2.f32 %v2058_v9 }
 0xae0   :  { %v2845_v11 = vpop.eup %2844 }
 0xae1   :  { %v2060_v25 = vmul.f32 0.6931472, %v2845_v11 }
 0xae3   :  { %v2061_v45 = vadd.f32 %v2060_v25, %v2053_v62 }
 0xae5   :  { %v2062_v15 = vsub.f32 %v2049_v54, %v2061_v45 }
 0xae7   :  { %2063 = vst [vmem:[#allocation6] sm:$0xff] %v2062_v15 }
 0xae8   :  { %2857 = shalt.err (!%p2854_p4)
}
 0xae9   :  { %s2858_s14 = scalar_lea.hbm %s3594_s6, 128 }
 0xaea   :  { %p2859_p5 = scmp.ne.s32.totalorder %s3594_s6, %s2858_s14  ;;  %p2862_p6 = scmp.lt.u32.totalorder %s2858_s14, %s3594_s6 }
 0xaec   :  { %p2864_p7 = pnand %p2862_p6, %p2859_p5 }
 0xaee   :  { %2867 = shalt.err (!%p2864_p7)
}
 0xaef   :  { %2073 = dma.vmem_to_hbm [thread:$0]  %s2071_s11, 128, %s3594_s6, [#allocation7]  }
 0xaf0   :  { %2868 = dma.done.wait [#allocation7], 128  }
 0xaf1   :  { %2869 = vsyncadd [#allocation7], 4294967168 }
 0xaf2   :  { %2077 = vsyncpa [#allocation7], 1 }

</bundles_post_ra>
